<compile_context>
chip_gen: v7x
topology: tpu7x:2x2x1
jax: 0.10.0
libtpu: 0.0.40
codegen_flags: <defaults>
</compile_context>

<pallas_src>
import functools
import math

import jax
import jax.numpy as jnp
from jax import lax
from jax.experimental import pallas as pl
from jax.experimental.pallas import tpu as pltpu


# ----------------------------- config (small) ------------------------------
VOCAB = 100
HIDDEN = 32
N_HEADS = 2
HEAD_DIM = HIDDEN // N_HEADS
N_LAYERS = 2
INTERMEDIATE = 64
MAX_POS = 16
TYPE_VOCAB = 2
LN_EPS = 1e-12


# --------------------------- in-kernel helpers ------------------------------
def _layernorm(x, gb):
    """x: (M, H) f32; gb: (2, H) with gamma in row 0, beta in row 1."""
    g = gb[0:1, :]
    b = gb[1:2, :]
    mu = jnp.mean(x, axis=-1, keepdims=True)
    var = jnp.mean((x - mu) * (x - mu), axis=-1, keepdims=True)
    return (x - mu) * lax.rsqrt(var + LN_EPS) * g + b


def _gelu(x):
    # tanh-approximate GELU (BERT reference is erf-GELU; difference ~1e-3)
    return 0.5 * x * (1.0 + jnp.tanh(0.7978845608028654 * (x + 0.044715 * x * x * x)))


# --------------------------- fused forward kernel ---------------------------
def _encoder_kernel(
    emb_ref,      # (S, H)   f32  embedding sum (pre-LN), this batch sample
    mask_ref,     # (1, S)   f32  attention mask (1 = keep, 0 = pad)
    embln_ref,    # (2, H)   f32  embedding LayerNorm gamma/beta
    wqkv_ref,     # (L, nh, H, 3*dh) bf16  head-major fused Q/K/V weights
    bqkv_ref,     # (L, nh, 1, 3*dh) f32
    wo_ref,       # (L, nh, dh, H)   bf16  attention output projection (per head)
    bo_ref,       # (L, 1, H) f32
    ln1_ref,      # (L, 2, H) f32
    wi_ref,       # (L, H, I) bf16  FFN intermediate
    bi_ref,       # (L, 1, I) f32
    wo2_ref,      # (L, I, H) bf16  FFN output
    bo2_ref,      # (L, 1, H) f32
    ln2_ref,      # (L, 2, H) f32
    *rest,        # [pooler_w (H,H) bf16, pooler_b (1,H) f32] iff pooling=='pooler',
                  # then out_ref (1, H)
    pooling, seq,
):
    out_ref = rest[-1]
    S, H, nh, dh = seq, HIDDEN, N_HEADS, HEAD_DIM
    scale = 1.0 / math.sqrt(dh)
    bf16 = jnp.bfloat16

    # additive attention mask, built in-kernel: (1, 1, S), broadcast over heads/rows
    add_mask = ((1.0 - mask_ref[...]) * -10000.0)[None, :, :]

    # Embedding LayerNorm (hidden_states[0] in HF convention).
    x = _layernorm(emb_ref[...], embln_ref[...])          # (S, H) f32

    first_layer_out = None
    for l in range(N_LAYERS):
        # ---- head-major fused QKV projection: one nh-batched MXU pass ----
        xb = jnp.broadcast_to(x.astype(bf16)[None], (nh, S, H))
        qkv = jnp.einsum("hmd,hde->hme", xb, wqkv_ref[l],
                         preferred_element_type=jnp.float32) + bqkv_ref[l]  # (nh,S,3dh)
        q = qkv[:, :, 0:dh]
        k = qkv[:, :, dh:2 * dh]
        v = qkv[:, :, 2 * dh:3 * dh]

        # ---- multi-head self-attention: single batched dots over heads ----
        s = jnp.einsum("hqd,hkd->hqk", q.astype(bf16), k.astype(bf16),
                       preferred_element_type=jnp.float32) * scale + add_mask
        s = s - jnp.max(s, axis=-1, keepdims=True)
        p = jnp.exp(s)
        p = p * pl.reciprocal(jnp.sum(p, axis=-1, keepdims=True), approx=True)
        ctx = jnp.einsum("hqk,hkd->hqd", p.astype(bf16), v.astype(bf16),
                         preferred_element_type=jnp.float32)                # (nh,S,dh)

        # ---- output projection: per-head (dh,H) matmuls, summed in vregs ----
        attn = jnp.einsum("hmd,hde->hme", ctx.astype(bf16), wo_ref[l],
                          preferred_element_type=jnp.float32)               # (nh,S,H)
        attn = jnp.sum(attn, axis=0) + bo_ref[l]                            # (S, H)
        h1 = _layernorm(x + attn, ln1_ref[l])

        # ---- feed-forward (GELU) + residual LN ----
        inter = _gelu(jnp.dot(h1.astype(bf16), wi_ref[l],
                              preferred_element_type=jnp.float32) + bi_ref[l])
        ffn = jnp.dot(inter.astype(bf16), wo2_ref[l],
                      preferred_element_type=jnp.float32) + bo2_ref[l]
        x = _layernorm(h1 + ffn, ln2_ref[l])

        if l == 0:
            first_layer_out = x                            # hidden_states[1]

    # ---- pooling epilogue (mode baked in at trace time, single store) ----
    if pooling == "cls":
        pooled = x[0:1, :]
    elif pooling == "pooler":
        pw = rest[0][...]                                  # (H, H) bf16
        pb = rest[1][...]                                  # (1, H) f32
        pooled = jnp.tanh(jnp.dot(x[0:1, :].astype(bf16), pw,
                                  preferred_element_type=jnp.float32) + pb)
    elif pooling == "last-avg":
        pooled = jnp.mean(x, axis=0, keepdims=True)
    elif pooling == "first-last-avg":
        pooled = 0.5 * (jnp.mean(first_layer_out, axis=0, keepdims=True)
                        + jnp.mean(x, axis=0, keepdims=True))
    else:
        raise ValueError(f"unknown pooling {pooling}")

    out_ref[...] = pooled.astype(out_ref.dtype)


# ---------------------------- host-side wrapper -----------------------------
def _const_spec(shape):
    nd = len(shape)
    return pl.BlockSpec(shape, lambda b, _nd=nd: (0,) * _nd)


def _forward(input_ids, attention_mask, token_type_ids,
             word_emb, pos_emb, type_emb, embln, layer_params, pooler,
             *, pooling):
    B, S = input_ids.shape

    # Embedding gathers (tiny host-side glue).
    we = word_emb[input_ids]                         # (B, S, H)
    pe = pos_emb[:S][None, :, :]                     # (1, S, H)
    te = type_emb[token_type_ids]                    # (B, S, H)
    emb = (we + pe + te).astype(jnp.float32)         # (B, S, H)
    mask = attention_mask.astype(jnp.float32).reshape(B, 1, S)

    inputs = (emb, mask, embln) + layer_params + pooler
    in_specs = [
        pl.BlockSpec((None, S, HIDDEN), lambda b: (b, 0, 0)),   # emb, per batch
        pl.BlockSpec((None, 1, S), lambda b: (b, 0, 0)),        # mask, per batch
    ] + [_const_spec(a.shape) for a in (embln,) + layer_params + pooler]

    kernel = functools.partial(_encoder_kernel, pooling=pooling, seq=S)

    out = pl.pallas_call(
        kernel,
        grid=(B,),
        out_shape=jax.ShapeDtypeStruct((B, 1, HIDDEN), jnp.float32),
        in_specs=in_specs,
        out_specs=pl.BlockSpec((None, 1, HIDDEN), lambda b: (b, 0, 0)),
        compiler_params=pltpu.CompilerParams(
            dimension_semantics=("parallel",),
            vmem_limit_bytes=16 * 1024 * 1024),
    )(*inputs)
    return out.reshape(B, HIDDEN)


def _stack_layer_params(layers):
    """Stack per-layer weights along L; convert to head-major layout + bf16."""
    nh, dh = N_HEADS, HEAD_DIM

    def head_major_cols(w):   # (H, H) -> (nh, H, dh): head h gets cols h*dh:(h+1)*dh
        return jnp.transpose(w.reshape(HIDDEN, nh, dh), (1, 0, 2))

    wqkv = jnp.stack([
        jnp.concatenate([head_major_cols(lp["wq"]),
                         head_major_cols(lp["wk"]),
                         head_major_cols(lp["wv"])], axis=-1)
        for lp in layers]).astype(jnp.bfloat16)                    # (L, nh, H, 3dh)
    bqkv = jnp.stack([
        jnp.concatenate([lp["bq"].reshape(nh, 1, dh),
                         lp["bk"].reshape(nh, 1, dh),
                         lp["bv"].reshape(nh, 1, dh)], axis=-1)
        for lp in layers])                                         # (L, nh, 1, 3dh)
    wo = jnp.stack([lp["wo"].reshape(nh, dh, HIDDEN)
                    for lp in layers]).astype(jnp.bfloat16)        # (L, nh, dh, H)
    bo = jnp.stack([lp["bo"].reshape(1, HIDDEN) for lp in layers])
    ln1 = jnp.stack([jnp.stack([lp["ln1_g"], lp["ln1_b"]]) for lp in layers])
    wi = jnp.stack([lp["wi"] for lp in layers]).astype(jnp.bfloat16)
    bi = jnp.stack([lp["bi"].reshape(1, INTERMEDIATE) for lp in layers])
    wo2 = jnp.stack([lp["wo2"] for lp in layers]).astype(jnp.bfloat16)
    bo2 = jnp.stack([lp["bo2"].reshape(1, HIDDEN) for lp in layers])
    ln2 = jnp.stack([jnp.stack([lp["ln2_g"], lp["ln2_b"]]) for lp in layers])
    return (wqkv, bqkv, wo, bo, ln1, wi, bi, wo2, bo2, ln2)


# --------------------------- synthetic BERT params --------------------------
def init_params(key):
    std = 0.02

    def norm(k, shape):
        return std * jax.random.normal(k, shape, dtype=jnp.float32)

    keys = jax.random.split(key, 4 + N_LAYERS)
    p = {
        "word_emb": norm(keys[0], (VOCAB, HIDDEN)),
        "pos_emb": norm(keys[1], (MAX_POS, HIDDEN)),
        "type_emb": norm(keys[2], (TYPE_VOCAB, HIDDEN)),
        "emb_ln_g": jnp.ones((HIDDEN,), jnp.float32),
        "emb_ln_b": jnp.zeros((HIDDEN,), jnp.float32),
        "pooler_w": norm(keys[3], (HIDDEN, HIDDEN)),
        "pooler_b": jnp.zeros((HIDDEN,), jnp.float32),
        "layers": [],
    }
    for li in range(N_LAYERS):
        lk = jax.random.split(keys[4 + li], 6)
        p["layers"].append(
            {
                "wq": norm(lk[0], (HIDDEN, HIDDEN)),
                "bq": jnp.zeros((HIDDEN,), jnp.float32),
                "wk": norm(lk[1], (HIDDEN, HIDDEN)),
                "bk": jnp.zeros((HIDDEN,), jnp.float32),
                "wv": norm(lk[2], (HIDDEN, HIDDEN)),
                "bv": jnp.zeros((HIDDEN,), jnp.float32),
                "wo": norm(lk[3], (HIDDEN, HIDDEN)),
                "bo": jnp.zeros((HIDDEN,), jnp.float32),
                "ln1_g": jnp.ones((HIDDEN,), jnp.float32),
                "ln1_b": jnp.zeros((HIDDEN,), jnp.float32),
                "wi": norm(lk[4], (HIDDEN, INTERMEDIATE)),
                "bi": jnp.zeros((INTERMEDIATE,), jnp.float32),
                "wo2": norm(lk[5], (INTERMEDIATE, HIDDEN)),
                "bo2": jnp.zeros((HIDDEN,), jnp.float32),
                "ln2_g": jnp.ones((HIDDEN,), jnp.float32),
                "ln2_b": jnp.zeros((HIDDEN,), jnp.float32),
            }
        )
    return p


# ------------------------------- SimcseModel --------------------------------
class SimcseModel:
    """JAX/Pallas re-implementation of the SimCSE unsupervised model forward."""

    def __init__(self, params, pooling):
        if pooling not in ("cls", "pooler", "last-avg", "first-last-avg"):
            raise ValueError(f"unknown pooling {pooling}")
        self.pooling = pooling
        self.word_emb = params["word_emb"]
        self.pos_emb = params["pos_emb"]
        self.type_emb = params["type_emb"]
        self.embln = jnp.stack([params["emb_ln_g"], params["emb_ln_b"]])
        self.layer_params = _stack_layer_params(params["layers"])
        if pooling == "pooler":
            self.pooler = (params["pooler_w"].astype(jnp.bfloat16),
                           params["pooler_b"].reshape(1, HIDDEN))
        else:
            self.pooler = ()   # pooler head is never emitted for other modes
        self._fwd = jax.jit(functools.partial(_forward, pooling=pooling))

    def __call__(self, input_ids, attention_mask, token_type_ids):
        return self._fwd(
            input_ids, attention_mask, token_type_ids,
            self.word_emb, self.pos_emb, self.type_emb,
            self.embln, self.layer_params, self.pooler)


# ---------------------------------- main -------------------------------------
if __name__ == "__main__":
    B, S = 2, 8
    key = jax.random.PRNGKey(0)
    k_param, k_ids = jax.random.split(key)

    params = init_params(k_param)

    input_ids = jax.random.randint(k_ids, (B, S), 0, VOCAB, dtype=jnp.int32)
    attention_mask = jnp.ones((B, S), dtype=jnp.int32)
    token_type_ids = jnp.zeros((B, S), dtype=jnp.int32)

    model = SimcseModel(params, pooling="first-last-avg")
    out = jax.block_until_ready(model(input_ids, attention_mask, token_type_ids))
    assert out.shape == (B, HIDDEN) and out.dtype == jnp.float32
    assert bool(jnp.all(jnp.isfinite(out)))

    # also exercise the other pooling heads once
    for mode in ("cls", "pooler", "last-avg"):
        o = jax.block_until_ready(
            SimcseModel(params, pooling=mode)(input_ids, attention_mask,
                                              token_type_ids)
        )
        assert o.shape == (B, HIDDEN)
        assert bool(jnp.all(jnp.isfinite(o)))

    print("KERNEL_OK")
</pallas_src>

<mosaic_0001>
module attributes {stable_mosaic.version = 11 : i64} {
  func.func @_encoder_kernel(%arg0: i32, %arg1: memref<1x8x32xf32, #tpu.memory_space<vmem>>, %arg2: memref<1x1x8xf32, #tpu.memory_space<vmem>>, %arg3: memref<2x32xf32, #tpu.memory_space<vmem>>, %arg4: memref<2x2x32x48xbf16, #tpu.memory_space<vmem>>, %arg5: memref<2x2x1x48xf32, #tpu.memory_space<vmem>>, %arg6: memref<2x2x16x32xbf16, #tpu.memory_space<vmem>>, %arg7: memref<2x1x32xf32, #tpu.memory_space<vmem>>, %arg8: memref<2x2x32xf32, #tpu.memory_space<vmem>>, %arg9: memref<2x32x64xbf16, #tpu.memory_space<vmem>>, %arg10: memref<2x1x64xf32, #tpu.memory_space<vmem>>, %arg11: memref<2x64x32xbf16, #tpu.memory_space<vmem>>, %arg12: memref<2x1x32xf32, #tpu.memory_space<vmem>>, %arg13: memref<2x2x32xf32, #tpu.memory_space<vmem>>, %arg14: memref<1x1x32xf32, #tpu.memory_space<vmem>>) attributes {dimension_semantics = [#tpu.dimension_semantics<parallel>], iteration_bounds = array<i64: 2>, scalar_prefetch = 0 : i64, scratch_operands = 0 : i64, tpu.core_type = #tpu.core_type<tc>, window_params = [{transform_indices = @transform_0, window_bounds = array<i64: 1, 8, 32>}, {transform_indices = @transform_1, window_bounds = array<i64: 1, 1, 8>}, {pipeline_mode = #tpu.pipeline_mode<synchronous>, transform_indices = @transform_2, window_bounds = array<i64: 2, 32>}, {pipeline_mode = #tpu.pipeline_mode<synchronous>, transform_indices = @transform_3, window_bounds = array<i64: 2, 2, 32, 48>}, {pipeline_mode = #tpu.pipeline_mode<synchronous>, transform_indices = @transform_4, window_bounds = array<i64: 2, 2, 1, 48>}, {pipeline_mode = #tpu.pipeline_mode<synchronous>, transform_indices = @transform_5, window_bounds = array<i64: 2, 2, 16, 32>}, {pipeline_mode = #tpu.pipeline_mode<synchronous>, transform_indices = @transform_6, window_bounds = array<i64: 2, 1, 32>}, {pipeline_mode = #tpu.pipeline_mode<synchronous>, transform_indices = @transform_7, window_bounds = array<i64: 2, 2, 32>}, {pipeline_mode = #tpu.pipeline_mode<synchronous>, transform_indices = @transform_8, window_bounds = array<i64: 2, 32, 64>}, {pipeline_mode = #tpu.pipeline_mode<synchronous>, transform_indices = @transform_9, window_bounds = array<i64: 2, 1, 64>}, {pipeline_mode = #tpu.pipeline_mode<synchronous>, transform_indices = @transform_10, window_bounds = array<i64: 2, 64, 32>}, {pipeline_mode = #tpu.pipeline_mode<synchronous>, transform_indices = @transform_11, window_bounds = array<i64: 2, 1, 32>}, {pipeline_mode = #tpu.pipeline_mode<synchronous>, transform_indices = @transform_12, window_bounds = array<i64: 2, 2, 32>}, {transform_indices = @transform_13, window_bounds = array<i64: 1, 1, 32>}]} {
    %c0 = arith.constant 0 : index
    %c0_0 = arith.constant 0 : index
    %c0_1 = arith.constant 0 : index
    %0 = vector.load %arg2[%c0, %c0_0, %c0_1] : memref<1x1x8xf32, #tpu.memory_space<vmem>>, vector<1x1x8xf32>
    %1 = vector.shape_cast %0 : vector<1x1x8xf32> to vector<1x8xf32>
    %cst = arith.constant 1.000000e+00 : f32
    %2 = vector.broadcast %cst : f32 to vector<1x8xf32>
    %3 = arith.subf %2, %1 : vector<1x8xf32>
    %cst_2 = arith.constant -1.000000e+04 : f32
    %4 = vector.broadcast %cst_2 : f32 to vector<1x8xf32>
    %5 = arith.mulf %3, %4 : vector<1x8xf32>
    %6 = vector.shape_cast %5 : vector<1x8xf32> to vector<1x1x8xf32>
    %c0_3 = arith.constant 0 : index
    %c0_4 = arith.constant 0 : index
    %c0_5 = arith.constant 0 : index
    %7 = vector.load %arg1[%c0_3, %c0_4, %c0_5] : memref<1x8x32xf32, #tpu.memory_space<vmem>>, vector<1x8x32xf32>
    %8 = vector.shape_cast %7 : vector<1x8x32xf32> to vector<8x32xf32>
    %c0_6 = arith.constant 0 : index
    %c0_7 = arith.constant 0 : index
    %9 = vector.load %arg3[%c0_6, %c0_7] : memref<2x32xf32, #tpu.memory_space<vmem>>, vector<2x32xf32>
    %10 = vector.extract_strided_slice %9 {offsets = [0, 0], sizes = [1, 32], strides = [1, 1]} : vector<2x32xf32> to vector<1x32xf32>
    %11 = vector.extract_strided_slice %9 {offsets = [1, 0], sizes = [1, 32], strides = [1, 1]} : vector<2x32xf32> to vector<1x32xf32>
    %cst_8 = arith.constant dense<0.000000e+00> : vector<8xf32>
    %12 = vector.multi_reduction <add>, %8, %cst_8 [1] : vector<8x32xf32> to vector<8xf32>
    %13 = vector.shape_cast %12 : vector<8xf32> to vector<8x1xf32>
    %cst_9 = arith.constant 3.200000e+01 : f32
    %14 = vector.broadcast %cst_9 : f32 to vector<8x1xf32>
    %15 = arith.divf %13, %14 : vector<8x1xf32>
    %16 = vector.broadcast %15 : vector<8x1xf32> to vector<8x32xf32>
    %17 = arith.subf %8, %16 : vector<8x32xf32>
    %18 = vector.broadcast %15 : vector<8x1xf32> to vector<8x32xf32>
    %19 = arith.subf %8, %18 : vector<8x32xf32>
    %20 = arith.mulf %17, %19 : vector<8x32xf32>
    %cst_10 = arith.constant dense<0.000000e+00> : vector<8xf32>
    %21 = vector.multi_reduction <add>, %20, %cst_10 [1] : vector<8x32xf32> to vector<8xf32>
    %22 = vector.shape_cast %21 : vector<8xf32> to vector<8x1xf32>
    %cst_11 = arith.constant 3.200000e+01 : f32
    %23 = vector.broadcast %cst_11 : f32 to vector<8x1xf32>
    %24 = arith.divf %22, %23 : vector<8x1xf32>
    %25 = vector.broadcast %15 : vector<8x1xf32> to vector<8x32xf32>
    %26 = arith.subf %8, %25 : vector<8x32xf32>
    %cst_12 = arith.constant 9.99999996E-13 : f32
    %27 = vector.broadcast %cst_12 : f32 to vector<8x1xf32>
    %28 = arith.addf %24, %27 : vector<8x1xf32>
    %29 = math.rsqrt %28 : vector<8x1xf32>
    %30 = vector.broadcast %29 : vector<8x1xf32> to vector<8x32xf32>
    %31 = arith.mulf %26, %30 : vector<8x32xf32>
    %32 = vector.broadcast %10 : vector<1x32xf32> to vector<8x32xf32>
    %33 = arith.mulf %31, %32 : vector<8x32xf32>
    %34 = vector.broadcast %11 : vector<1x32xf32> to vector<8x32xf32>
    %35 = arith.addf %33, %34 : vector<8x32xf32>
    %36 = arith.truncf %35 : vector<8x32xf32> to vector<8x32xbf16>
    %37 = vector.shape_cast %36 : vector<8x32xbf16> to vector<1x8x32xbf16>
    %38 = vector.shape_cast %37 : vector<1x8x32xbf16> to vector<1x8x32xbf16>
    %39 = vector.broadcast %38 : vector<1x8x32xbf16> to vector<2x8x32xbf16>
    %c0_13 = arith.constant 0 : index
    %c0_14 = arith.constant 0 : index
    %c0_15 = arith.constant 0 : index
    %c0_16 = arith.constant 0 : index
    %40 = vector.load %arg4[%c0_13, %c0_14, %c0_15, %c0_16] : memref<2x2x32x48xbf16, #tpu.memory_space<vmem>>, vector<1x2x32x48xbf16>
    %41 = vector.shape_cast %40 : vector<1x2x32x48xbf16> to vector<2x32x48xbf16>
    "tpu.trace_start"() <{level = 10 : i32, message = "hmd,hde->hme"}> : () -> ()
    %cst_17 = arith.constant dense<0.000000e+00> : vector<2x8x48xf32>
    %42 = tpu.matmul %39, %41, %cst_17 {dimension_numbers = #tpu.dot_dimension_numbers<[2], [1], [1], [2], [0, 0, 0, 1, 1, 2], [0], [0]>} : vector<2x8x32xbf16>, vector<2x32x48xbf16>, vector<2x8x48xf32> -> vector<2x8x48xf32>
    "tpu.trace_stop"() : () -> ()
    %c0_18 = arith.constant 0 : index
    %c0_19 = arith.constant 0 : index
    %c0_20 = arith.constant 0 : index
    %c0_21 = arith.constant 0 : index
    %43 = vector.load %arg5[%c0_18, %c0_19, %c0_20, %c0_21] : memref<2x2x1x48xf32, #tpu.memory_space<vmem>>, vector<1x2x1x48xf32>
    %44 = vector.shape_cast %43 : vector<1x2x1x48xf32> to vector<2x1x48xf32>
    %45 = vector.broadcast %44 : vector<2x1x48xf32> to vector<2x8x48xf32>
    %46 = arith.addf %42, %45 : vector<2x8x48xf32>
    %47 = vector.extract_strided_slice %46 {offsets = [0, 0, 0], sizes = [2, 8, 16], strides = [1, 1, 1]} : vector<2x8x48xf32> to vector<2x8x16xf32>
    %48 = vector.extract_strided_slice %46 {offsets = [0, 0, 16], sizes = [2, 8, 16], strides = [1, 1, 1]} : vector<2x8x48xf32> to vector<2x8x16xf32>
    %49 = vector.extract_strided_slice %46 {offsets = [0, 0, 32], sizes = [2, 8, 16], strides = [1, 1, 1]} : vector<2x8x48xf32> to vector<2x8x16xf32>
    %50 = arith.truncf %47 : vector<2x8x16xf32> to vector<2x8x16xbf16>
    %51 = arith.truncf %48 : vector<2x8x16xf32> to vector<2x8x16xbf16>
    "tpu.trace_start"() <{level = 10 : i32, message = "hqd,hkd->hqk"}> : () -> ()
    %cst_22 = arith.constant dense<0.000000e+00> : vector<2x8x8xf32>
    %52 = tpu.matmul %50, %51, %cst_22 {dimension_numbers = #tpu.dot_dimension_numbers<[2], [2], [1], [1], [0, 0, 0, 1, 1, 1], [0], [0]>} : vector<2x8x16xbf16>, vector<2x8x16xbf16>, vector<2x8x8xf32> -> vector<2x8x8xf32>
    "tpu.trace_stop"() : () -> ()
    %cst_23 = arith.constant 2.500000e-01 : f32
    %53 = vector.broadcast %cst_23 : f32 to vector<2x8x8xf32>
    %54 = arith.mulf %52, %53 : vector<2x8x8xf32>
    %55 = vector.broadcast %6 : vector<1x1x8xf32> to vector<2x8x8xf32>
    %56 = arith.addf %54, %55 : vector<2x8x8xf32>
    %cst_24 = arith.constant dense<0xFF800000> : vector<2x8xf32>
    %57 = vector.multi_reduction <maximumf>, %56, %cst_24 [2] : vector<2x8x8xf32> to vector<2x8xf32>
    %58 = vector.shape_cast %57 : vector<2x8xf32> to vector<2x8x1xf32>
    %59 = vector.broadcast %58 : vector<2x8x1xf32> to vector<2x8x8xf32>
    %60 = arith.subf %56, %59 : vector<2x8x8xf32>
    %61 = math.exp %60 : vector<2x8x8xf32>
    %cst_25 = arith.constant dense<0.000000e+00> : vector<2x8xf32>
    %62 = vector.multi_reduction <add>, %61, %cst_25 [2] : vector<2x8x8xf32> to vector<2x8xf32>
    %63 = vector.shape_cast %62 : vector<2x8xf32> to vector<2x8x1xf32>
    %64 = tpu.reciprocal %63 {approx = true} : vector<2x8x1xf32> -> vector<2x8x1xf32>
    %65 = vector.broadcast %64 : vector<2x8x1xf32> to vector<2x8x8xf32>
    %66 = arith.mulf %61, %65 : vector<2x8x8xf32>
    %67 = arith.truncf %66 : vector<2x8x8xf32> to vector<2x8x8xbf16>
    %68 = arith.truncf %49 : vector<2x8x16xf32> to vector<2x8x16xbf16>
    "tpu.trace_start"() <{level = 10 : i32, message = "hqk,hkd->hqd"}> : () -> ()
    %cst_26 = arith.constant dense<0.000000e+00> : vector<2x8x16xf32>
    %69 = tpu.matmul %67, %68, %cst_26 {dimension_numbers = #tpu.dot_dimension_numbers<[2], [1], [1], [2], [0, 0, 0, 1, 1, 2], [0], [0]>} : vector<2x8x8xbf16>, vector<2x8x16xbf16>, vector<2x8x16xf32> -> vector<2x8x16xf32>
    "tpu.trace_stop"() : () -> ()
    %70 = arith.truncf %69 : vector<2x8x16xf32> to vector<2x8x16xbf16>
    %c0_27 = arith.constant 0 : index
    %c0_28 = arith.constant 0 : index
    %c0_29 = arith.constant 0 : index
    %c0_30 = arith.constant 0 : index
    %71 = vector.load %arg6[%c0_27, %c0_28, %c0_29, %c0_30] : memref<2x2x16x32xbf16, #tpu.memory_space<vmem>>, vector<1x2x16x32xbf16>
    %72 = vector.shape_cast %71 : vector<1x2x16x32xbf16> to vector<2x16x32xbf16>
    "tpu.trace_start"() <{level = 10 : i32, message = "hmd,hde->hme"}> : () -> ()
    %cst_31 = arith.constant dense<0.000000e+00> : vector<2x8x32xf32>
    %73 = tpu.matmul %70, %72, %cst_31 {dimension_numbers = #tpu.dot_dimension_numbers<[2], [1], [1], [2], [0, 0, 0, 1, 1, 2], [0], [0]>} : vector<2x8x16xbf16>, vector<2x16x32xbf16>, vector<2x8x32xf32> -> vector<2x8x32xf32>
    "tpu.trace_stop"() : () -> ()
    %cst_32 = arith.constant dense<0.000000e+00> : vector<8x32xf32>
    %74 = vector.multi_reduction <add>, %73, %cst_32 [0] : vector<2x8x32xf32> to vector<8x32xf32>
    %c0_33 = arith.constant 0 : index
    %c0_34 = arith.constant 0 : index
    %c0_35 = arith.constant 0 : index
    %75 = vector.load %arg7[%c0_33, %c0_34, %c0_35] : memref<2x1x32xf32, #tpu.memory_space<vmem>>, vector<1x1x32xf32>
    %76 = vector.shape_cast %75 : vector<1x1x32xf32> to vector<1x32xf32>
    %77 = vector.broadcast %76 : vector<1x32xf32> to vector<8x32xf32>
    %78 = arith.addf %74, %77 : vector<8x32xf32>
    %79 = arith.addf %35, %78 : vector<8x32xf32>
    %c0_36 = arith.constant 0 : index
    %c0_37 = arith.constant 0 : index
    %c0_38 = arith.constant 0 : index
    %80 = vector.load %arg8[%c0_36, %c0_37, %c0_38] : memref<2x2x32xf32, #tpu.memory_space<vmem>>, vector<1x2x32xf32>
    %81 = vector.shape_cast %80 : vector<1x2x32xf32> to vector<2x32xf32>
    %82 = vector.extract_strided_slice %81 {offsets = [0, 0], sizes = [1, 32], strides = [1, 1]} : vector<2x32xf32> to vector<1x32xf32>
    %83 = vector.extract_strided_slice %81 {offsets = [1, 0], sizes = [1, 32], strides = [1, 1]} : vector<2x32xf32> to vector<1x32xf32>
    %cst_39 = arith.constant dense<0.000000e+00> : vector<8xf32>
    %84 = vector.multi_reduction <add>, %79, %cst_39 [1] : vector<8x32xf32> to vector<8xf32>
    %85 = vector.shape_cast %84 : vector<8xf32> to vector<8x1xf32>
    %cst_40 = arith.constant 3.200000e+01 : f32
    %86 = vector.broadcast %cst_40 : f32 to vector<8x1xf32>
    %87 = arith.divf %85, %86 : vector<8x1xf32>
    %88 = vector.broadcast %87 : vector<8x1xf32> to vector<8x32xf32>
    %89 = arith.subf %79, %88 : vector<8x32xf32>
    %90 = vector.broadcast %87 : vector<8x1xf32> to vector<8x32xf32>
    %91 = arith.subf %79, %90 : vector<8x32xf32>
    %92 = arith.mulf %89, %91 : vector<8x32xf32>
    %cst_41 = arith.constant dense<0.000000e+00> : vector<8xf32>
    %93 = vector.multi_reduction <add>, %92, %cst_41 [1] : vector<8x32xf32> to vector<8xf32>
    %94 = vector.shape_cast %93 : vector<8xf32> to vector<8x1xf32>
    %cst_42 = arith.constant 3.200000e+01 : f32
    %95 = vector.broadcast %cst_42 : f32 to vector<8x1xf32>
    %96 = arith.divf %94, %95 : vector<8x1xf32>
    %97 = vector.broadcast %87 : vector<8x1xf32> to vector<8x32xf32>
    %98 = arith.subf %79, %97 : vector<8x32xf32>
    %cst_43 = arith.constant 9.99999996E-13 : f32
    %99 = vector.broadcast %cst_43 : f32 to vector<8x1xf32>
    %100 = arith.addf %96, %99 : vector<8x1xf32>
    %101 = math.rsqrt %100 : vector<8x1xf32>
    %102 = vector.broadcast %101 : vector<8x1xf32> to vector<8x32xf32>
    %103 = arith.mulf %98, %102 : vector<8x32xf32>
    %104 = vector.broadcast %82 : vector<1x32xf32> to vector<8x32xf32>
    %105 = arith.mulf %103, %104 : vector<8x32xf32>
    %106 = vector.broadcast %83 : vector<1x32xf32> to vector<8x32xf32>
    %107 = arith.addf %105, %106 : vector<8x32xf32>
    %108 = arith.truncf %107 : vector<8x32xf32> to vector<8x32xbf16>
    %c0_44 = arith.constant 0 : index
    %c0_45 = arith.constant 0 : index
    %c0_46 = arith.constant 0 : index
    %109 = vector.load %arg9[%c0_44, %c0_45, %c0_46] : memref<2x32x64xbf16, #tpu.memory_space<vmem>>, vector<1x32x64xbf16>
    %110 = vector.shape_cast %109 : vector<1x32x64xbf16> to vector<32x64xbf16>
    %cst_47 = arith.constant dense<0.000000e+00> : vector<8x64xf32>
    %111 = tpu.matmul %108, %110, %cst_47 {dimension_numbers = #tpu.dot_dimension_numbers<[1], [0], [0], [1], [0, 0, 1, 1], [], []>} : vector<8x32xbf16>, vector<32x64xbf16>, vector<8x64xf32> -> vector<8x64xf32>
    %c0_48 = arith.constant 0 : index
    %c0_49 = arith.constant 0 : index
    %c0_50 = arith.constant 0 : index
    %112 = vector.load %arg10[%c0_48, %c0_49, %c0_50] : memref<2x1x64xf32, #tpu.memory_space<vmem>>, vector<1x1x64xf32>
    %113 = vector.shape_cast %112 : vector<1x1x64xf32> to vector<1x64xf32>
    %114 = vector.broadcast %113 : vector<1x64xf32> to vector<8x64xf32>
    %115 = arith.addf %111, %114 : vector<8x64xf32>
    %cst_51 = arith.constant 5.000000e-01 : f32
    %116 = vector.broadcast %cst_51 : f32 to vector<8x64xf32>
    %117 = arith.mulf %116, %115 : vector<8x64xf32>
    %cst_52 = arith.constant 4.471500e-02 : f32
    %118 = vector.broadcast %cst_52 : f32 to vector<8x64xf32>
    %119 = arith.mulf %118, %115 : vector<8x64xf32>
    %120 = arith.mulf %119, %115 : vector<8x64xf32>
    %121 = arith.mulf %120, %115 : vector<8x64xf32>
    %122 = arith.addf %115, %121 : vector<8x64xf32>
    %cst_53 = arith.constant 0.797884583 : f32
    %123 = vector.broadcast %cst_53 : f32 to vector<8x64xf32>
    %124 = arith.mulf %123, %122 : vector<8x64xf32>
    %125 = math.tanh %124 : vector<8x64xf32>
    %cst_54 = arith.constant 1.000000e+00 : f32
    %126 = vector.broadcast %cst_54 : f32 to vector<8x64xf32>
    %127 = arith.addf %126, %125 : vector<8x64xf32>
    %128 = arith.mulf %117, %127 : vector<8x64xf32>
    %129 = arith.truncf %128 : vector<8x64xf32> to vector<8x64xbf16>
    %c0_55 = arith.constant 0 : index
    %c0_56 = arith.constant 0 : index
    %c0_57 = arith.constant 0 : index
    %130 = vector.load %arg11[%c0_55, %c0_56, %c0_57] : memref<2x64x32xbf16, #tpu.memory_space<vmem>>, vector<1x64x32xbf16>
    %131 = vector.shape_cast %130 : vector<1x64x32xbf16> to vector<64x32xbf16>
    %cst_58 = arith.constant dense<0.000000e+00> : vector<8x32xf32>
    %132 = tpu.matmul %129, %131, %cst_58 {dimension_numbers = #tpu.dot_dimension_numbers<[1], [0], [0], [1], [0, 0, 1, 1], [], []>} : vector<8x64xbf16>, vector<64x32xbf16>, vector<8x32xf32> -> vector<8x32xf32>
    %c0_59 = arith.constant 0 : index
    %c0_60 = arith.constant 0 : index
    %c0_61 = arith.constant 0 : index
    %133 = vector.load %arg12[%c0_59, %c0_60, %c0_61] : memref<2x1x32xf32, #tpu.memory_space<vmem>>, vector<1x1x32xf32>
    %134 = vector.shape_cast %133 : vector<1x1x32xf32> to vector<1x32xf32>
    %135 = vector.broadcast %134 : vector<1x32xf32> to vector<8x32xf32>
    %136 = arith.addf %132, %135 : vector<8x32xf32>
    %137 = arith.addf %107, %136 : vector<8x32xf32>
    %c0_62 = arith.constant 0 : index
    %c0_63 = arith.constant 0 : index
    %c0_64 = arith.constant 0 : index
    %138 = vector.load %arg13[%c0_62, %c0_63, %c0_64] : memref<2x2x32xf32, #tpu.memory_space<vmem>>, vector<1x2x32xf32>
    %139 = vector.shape_cast %138 : vector<1x2x32xf32> to vector<2x32xf32>
    %140 = vector.extract_strided_slice %139 {offsets = [0, 0], sizes = [1, 32], strides = [1, 1]} : vector<2x32xf32> to vector<1x32xf32>
    %141 = vector.extract_strided_slice %139 {offsets = [1, 0], sizes = [1, 32], strides = [1, 1]} : vector<2x32xf32> to vector<1x32xf32>
    %cst_65 = arith.constant dense<0.000000e+00> : vector<8xf32>
    %142 = vector.multi_reduction <add>, %137, %cst_65 [1] : vector<8x32xf32> to vector<8xf32>
    %143 = vector.shape_cast %142 : vector<8xf32> to vector<8x1xf32>
    %cst_66 = arith.constant 3.200000e+01 : f32
    %144 = vector.broadcast %cst_66 : f32 to vector<8x1xf32>
    %145 = arith.divf %143, %144 : vector<8x1xf32>
    %146 = vector.broadcast %145 : vector<8x1xf32> to vector<8x32xf32>
    %147 = arith.subf %137, %146 : vector<8x32xf32>
    %148 = vector.broadcast %145 : vector<8x1xf32> to vector<8x32xf32>
    %149 = arith.subf %137, %148 : vector<8x32xf32>
    %150 = arith.mulf %147, %149 : vector<8x32xf32>
    %cst_67 = arith.constant dense<0.000000e+00> : vector<8xf32>
    %151 = vector.multi_reduction <add>, %150, %cst_67 [1] : vector<8x32xf32> to vector<8xf32>
    %152 = vector.shape_cast %151 : vector<8xf32> to vector<8x1xf32>
    %cst_68 = arith.constant 3.200000e+01 : f32
    %153 = vector.broadcast %cst_68 : f32 to vector<8x1xf32>
    %154 = arith.divf %152, %153 : vector<8x1xf32>
    %155 = vector.broadcast %145 : vector<8x1xf32> to vector<8x32xf32>
    %156 = arith.subf %137, %155 : vector<8x32xf32>
    %cst_69 = arith.constant 9.99999996E-13 : f32
    %157 = vector.broadcast %cst_69 : f32 to vector<8x1xf32>
    %158 = arith.addf %154, %157 : vector<8x1xf32>
    %159 = math.rsqrt %158 : vector<8x1xf32>
    %160 = vector.broadcast %159 : vector<8x1xf32> to vector<8x32xf32>
    %161 = arith.mulf %156, %160 : vector<8x32xf32>
    %162 = vector.broadcast %140 : vector<1x32xf32> to vector<8x32xf32>
    %163 = arith.mulf %161, %162 : vector<8x32xf32>
    %164 = vector.broadcast %141 : vector<1x32xf32> to vector<8x32xf32>
    %165 = arith.addf %163, %164 : vector<8x32xf32>
    %166 = arith.truncf %165 : vector<8x32xf32> to vector<8x32xbf16>
    %167 = vector.shape_cast %166 : vector<8x32xbf16> to vector<1x8x32xbf16>
    %168 = vector.shape_cast %167 : vector<1x8x32xbf16> to vector<1x8x32xbf16>
    %169 = vector.broadcast %168 : vector<1x8x32xbf16> to vector<2x8x32xbf16>
    %c1 = arith.constant 1 : index
    %c0_70 = arith.constant 0 : index
    %c0_71 = arith.constant 0 : index
    %c0_72 = arith.constant 0 : index
    %170 = vector.load %arg4[%c1, %c0_70, %c0_71, %c0_72] : memref<2x2x32x48xbf16, #tpu.memory_space<vmem>>, vector<1x2x32x48xbf16>
    %171 = vector.shape_cast %170 : vector<1x2x32x48xbf16> to vector<2x32x48xbf16>
    "tpu.trace_start"() <{level = 10 : i32, message = "hmd,hde->hme"}> : () -> ()
    %cst_73 = arith.constant dense<0.000000e+00> : vector<2x8x48xf32>
    %172 = tpu.matmul %169, %171, %cst_73 {dimension_numbers = #tpu.dot_dimension_numbers<[2], [1], [1], [2], [0, 0, 0, 1, 1, 2], [0], [0]>} : vector<2x8x32xbf16>, vector<2x32x48xbf16>, vector<2x8x48xf32> -> vector<2x8x48xf32>
    "tpu.trace_stop"() : () -> ()
    %c1_74 = arith.constant 1 : index
    %c0_75 = arith.constant 0 : index
    %c0_76 = arith.constant 0 : index
    %c0_77 = arith.constant 0 : index
    %173 = vector.load %arg5[%c1_74, %c0_75, %c0_76, %c0_77] : memref<2x2x1x48xf32, #tpu.memory_space<vmem>>, vector<1x2x1x48xf32>
    %174 = vector.shape_cast %173 : vector<1x2x1x48xf32> to vector<2x1x48xf32>
    %175 = vector.broadcast %174 : vector<2x1x48xf32> to vector<2x8x48xf32>
    %176 = arith.addf %172, %175 : vector<2x8x48xf32>
    %177 = vector.extract_strided_slice %176 {offsets = [0, 0, 0], sizes = [2, 8, 16], strides = [1, 1, 1]} : vector<2x8x48xf32> to vector<2x8x16xf32>
    %178 = vector.extract_strided_slice %176 {offsets = [0, 0, 16], sizes = [2, 8, 16], strides = [1, 1, 1]} : vector<2x8x48xf32> to vector<2x8x16xf32>
    %179 = vector.extract_strided_slice %176 {offsets = [0, 0, 32], sizes = [2, 8, 16], strides = [1, 1, 1]} : vector<2x8x48xf32> to vector<2x8x16xf32>
    %180 = arith.truncf %177 : vector<2x8x16xf32> to vector<2x8x16xbf16>
    %181 = arith.truncf %178 : vector<2x8x16xf32> to vector<2x8x16xbf16>
    "tpu.trace_start"() <{level = 10 : i32, message = "hqd,hkd->hqk"}> : () -> ()
    %cst_78 = arith.constant dense<0.000000e+00> : vector<2x8x8xf32>
    %182 = tpu.matmul %180, %181, %cst_78 {dimension_numbers = #tpu.dot_dimension_numbers<[2], [2], [1], [1], [0, 0, 0, 1, 1, 1], [0], [0]>} : vector<2x8x16xbf16>, vector<2x8x16xbf16>, vector<2x8x8xf32> -> vector<2x8x8xf32>
    "tpu.trace_stop"() : () -> ()
    %cst_79 = arith.constant 2.500000e-01 : f32
    %183 = vector.broadcast %cst_79 : f32 to vector<2x8x8xf32>
    %184 = arith.mulf %182, %183 : vector<2x8x8xf32>
    %185 = vector.broadcast %6 : vector<1x1x8xf32> to vector<2x8x8xf32>
    %186 = arith.addf %184, %185 : vector<2x8x8xf32>
    %cst_80 = arith.constant dense<0xFF800000> : vector<2x8xf32>
    %187 = vector.multi_reduction <maximumf>, %186, %cst_80 [2] : vector<2x8x8xf32> to vector<2x8xf32>
    %188 = vector.shape_cast %187 : vector<2x8xf32> to vector<2x8x1xf32>
    %189 = vector.broadcast %188 : vector<2x8x1xf32> to vector<2x8x8xf32>
    %190 = arith.subf %186, %189 : vector<2x8x8xf32>
    %191 = math.exp %190 : vector<2x8x8xf32>
    %cst_81 = arith.constant dense<0.000000e+00> : vector<2x8xf32>
    %192 = vector.multi_reduction <add>, %191, %cst_81 [2] : vector<2x8x8xf32> to vector<2x8xf32>
    %193 = vector.shape_cast %192 : vector<2x8xf32> to vector<2x8x1xf32>
    %194 = tpu.reciprocal %193 {approx = true} : vector<2x8x1xf32> -> vector<2x8x1xf32>
    %195 = vector.broadcast %194 : vector<2x8x1xf32> to vector<2x8x8xf32>
    %196 = arith.mulf %191, %195 : vector<2x8x8xf32>
    %197 = arith.truncf %196 : vector<2x8x8xf32> to vector<2x8x8xbf16>
    %198 = arith.truncf %179 : vector<2x8x16xf32> to vector<2x8x16xbf16>
    "tpu.trace_start"() <{level = 10 : i32, message = "hqk,hkd->hqd"}> : () -> ()
    %cst_82 = arith.constant dense<0.000000e+00> : vector<2x8x16xf32>
    %199 = tpu.matmul %197, %198, %cst_82 {dimension_numbers = #tpu.dot_dimension_numbers<[2], [1], [1], [2], [0, 0, 0, 1, 1, 2], [0], [0]>} : vector<2x8x8xbf16>, vector<2x8x16xbf16>, vector<2x8x16xf32> -> vector<2x8x16xf32>
    "tpu.trace_stop"() : () -> ()
    %200 = arith.truncf %199 : vector<2x8x16xf32> to vector<2x8x16xbf16>
    %c1_83 = arith.constant 1 : index
    %c0_84 = arith.constant 0 : index
    %c0_85 = arith.constant 0 : index
    %c0_86 = arith.constant 0 : index
    %201 = vector.load %arg6[%c1_83, %c0_84, %c0_85, %c0_86] : memref<2x2x16x32xbf16, #tpu.memory_space<vmem>>, vector<1x2x16x32xbf16>
    %202 = vector.shape_cast %201 : vector<1x2x16x32xbf16> to vector<2x16x32xbf16>
    "tpu.trace_start"() <{level = 10 : i32, message = "hmd,hde->hme"}> : () -> ()
    %cst_87 = arith.constant dense<0.000000e+00> : vector<2x8x32xf32>
    %203 = tpu.matmul %200, %202, %cst_87 {dimension_numbers = #tpu.dot_dimension_numbers<[2], [1], [1], [2], [0, 0, 0, 1, 1, 2], [0], [0]>} : vector<2x8x16xbf16>, vector<2x16x32xbf16>, vector<2x8x32xf32> -> vector<2x8x32xf32>
    "tpu.trace_stop"() : () -> ()
    %cst_88 = arith.constant dense<0.000000e+00> : vector<8x32xf32>
    %204 = vector.multi_reduction <add>, %203, %cst_88 [0] : vector<2x8x32xf32> to vector<8x32xf32>
    %c1_89 = arith.constant 1 : index
    %c0_90 = arith.constant 0 : index
    %c0_91 = arith.constant 0 : index
    %205 = vector.load %arg7[%c1_89, %c0_90, %c0_91] : memref<2x1x32xf32, #tpu.memory_space<vmem>>, vector<1x1x32xf32>
    %206 = vector.shape_cast %205 : vector<1x1x32xf32> to vector<1x32xf32>
    %207 = vector.broadcast %206 : vector<1x32xf32> to vector<8x32xf32>
    %208 = arith.addf %204, %207 : vector<8x32xf32>
    %209 = arith.addf %165, %208 : vector<8x32xf32>
    %c1_92 = arith.constant 1 : index
    %c0_93 = arith.constant 0 : index
    %c0_94 = arith.constant 0 : index
    %210 = vector.load %arg8[%c1_92, %c0_93, %c0_94] : memref<2x2x32xf32, #tpu.memory_space<vmem>>, vector<1x2x32xf32>
    %211 = vector.shape_cast %210 : vector<1x2x32xf32> to vector<2x32xf32>
    %212 = vector.extract_strided_slice %211 {offsets = [0, 0], sizes = [1, 32], strides = [1, 1]} : vector<2x32xf32> to vector<1x32xf32>
    %213 = vector.extract_strided_slice %211 {offsets = [1, 0], sizes = [1, 32], strides = [1, 1]} : vector<2x32xf32> to vector<1x32xf32>
    %cst_95 = arith.constant dense<0.000000e+00> : vector<8xf32>
    %214 = vector.multi_reduction <add>, %209, %cst_95 [1] : vector<8x32xf32> to vector<8xf32>
    %215 = vector.shape_cast %214 : vector<8xf32> to vector<8x1xf32>
    %cst_96 = arith.constant 3.200000e+01 : f32
    %216 = vector.broadcast %cst_96 : f32 to vector<8x1xf32>
    %217 = arith.divf %215, %216 : vector<8x1xf32>
    %218 = vector.broadcast %217 : vector<8x1xf32> to vector<8x32xf32>
    %219 = arith.subf %209, %218 : vector<8x32xf32>
    %220 = vector.broadcast %217 : vector<8x1xf32> to vector<8x32xf32>
    %221 = arith.subf %209, %220 : vector<8x32xf32>
    %222 = arith.mulf %219, %221 : vector<8x32xf32>
    %cst_97 = arith.constant dense<0.000000e+00> : vector<8xf32>
    %223 = vector.multi_reduction <add>, %222, %cst_97 [1] : vector<8x32xf32> to vector<8xf32>
    %224 = vector.shape_cast %223 : vector<8xf32> to vector<8x1xf32>
    %cst_98 = arith.constant 3.200000e+01 : f32
    %225 = vector.broadcast %cst_98 : f32 to vector<8x1xf32>
    %226 = arith.divf %224, %225 : vector<8x1xf32>
    %227 = vector.broadcast %217 : vector<8x1xf32> to vector<8x32xf32>
    %228 = arith.subf %209, %227 : vector<8x32xf32>
    %cst_99 = arith.constant 9.99999996E-13 : f32
    %229 = vector.broadcast %cst_99 : f32 to vector<8x1xf32>
    %230 = arith.addf %226, %229 : vector<8x1xf32>
    %231 = math.rsqrt %230 : vector<8x1xf32>
    %232 = vector.broadcast %231 : vector<8x1xf32> to vector<8x32xf32>
    %233 = arith.mulf %228, %232 : vector<8x32xf32>
    %234 = vector.broadcast %212 : vector<1x32xf32> to vector<8x32xf32>
    %235 = arith.mulf %233, %234 : vector<8x32xf32>
    %236 = vector.broadcast %213 : vector<1x32xf32> to vector<8x32xf32>
    %237 = arith.addf %235, %236 : vector<8x32xf32>
    %238 = arith.truncf %237 : vector<8x32xf32> to vector<8x32xbf16>
    %c1_100 = arith.constant 1 : index
    %c0_101 = arith.constant 0 : index
    %c0_102 = arith.constant 0 : index
    %239 = vector.load %arg9[%c1_100, %c0_101, %c0_102] : memref<2x32x64xbf16, #tpu.memory_space<vmem>>, vector<1x32x64xbf16>
    %240 = vector.shape_cast %239 : vector<1x32x64xbf16> to vector<32x64xbf16>
    %cst_103 = arith.constant dense<0.000000e+00> : vector<8x64xf32>
    %241 = tpu.matmul %238, %240, %cst_103 {dimension_numbers = #tpu.dot_dimension_numbers<[1], [0], [0], [1], [0, 0, 1, 1], [], []>} : vector<8x32xbf16>, vector<32x64xbf16>, vector<8x64xf32> -> vector<8x64xf32>
    %c1_104 = arith.constant 1 : index
    %c0_105 = arith.constant 0 : index
    %c0_106 = arith.constant 0 : index
    %242 = vector.load %arg10[%c1_104, %c0_105, %c0_106] : memref<2x1x64xf32, #tpu.memory_space<vmem>>, vector<1x1x64xf32>
    %243 = vector.shape_cast %242 : vector<1x1x64xf32> to vector<1x64xf32>
    %244 = vector.broadcast %243 : vector<1x64xf32> to vector<8x64xf32>
    %245 = arith.addf %241, %244 : vector<8x64xf32>
    %cst_107 = arith.constant 5.000000e-01 : f32
    %246 = vector.broadcast %cst_107 : f32 to vector<8x64xf32>
    %247 = arith.mulf %246, %245 : vector<8x64xf32>
    %cst_108 = arith.constant 4.471500e-02 : f32
    %248 = vector.broadcast %cst_108 : f32 to vector<8x64xf32>
    %249 = arith.mulf %248, %245 : vector<8x64xf32>
    %250 = arith.mulf %249, %245 : vector<8x64xf32>
    %251 = arith.mulf %250, %245 : vector<8x64xf32>
    %252 = arith.addf %245, %251 : vector<8x64xf32>
    %cst_109 = arith.constant 0.797884583 : f32
    %253 = vector.broadcast %cst_109 : f32 to vector<8x64xf32>
    %254 = arith.mulf %253, %252 : vector<8x64xf32>
    %255 = math.tanh %254 : vector<8x64xf32>
    %cst_110 = arith.constant 1.000000e+00 : f32
    %256 = vector.broadcast %cst_110 : f32 to vector<8x64xf32>
    %257 = arith.addf %256, %255 : vector<8x64xf32>
    %258 = arith.mulf %247, %257 : vector<8x64xf32>
    %259 = arith.truncf %258 : vector<8x64xf32> to vector<8x64xbf16>
    %c1_111 = arith.constant 1 : index
    %c0_112 = arith.constant 0 : index
    %c0_113 = arith.constant 0 : index
    %260 = vector.load %arg11[%c1_111, %c0_112, %c0_113] : memref<2x64x32xbf16, #tpu.memory_space<vmem>>, vector<1x64x32xbf16>
    %261 = vector.shape_cast %260 : vector<1x64x32xbf16> to vector<64x32xbf16>
    %cst_114 = arith.constant dense<0.000000e+00> : vector<8x32xf32>
    %262 = tpu.matmul %259, %261, %cst_114 {dimension_numbers = #tpu.dot_dimension_numbers<[1], [0], [0], [1], [0, 0, 1, 1], [], []>} : vector<8x64xbf16>, vector<64x32xbf16>, vector<8x32xf32> -> vector<8x32xf32>
    %c1_115 = arith.constant 1 : index
    %c0_116 = arith.constant 0 : index
    %c0_117 = arith.constant 0 : index
    %263 = vector.load %arg12[%c1_115, %c0_116, %c0_117] : memref<2x1x32xf32, #tpu.memory_space<vmem>>, vector<1x1x32xf32>
    %264 = vector.shape_cast %263 : vector<1x1x32xf32> to vector<1x32xf32>
    %265 = vector.broadcast %264 : vector<1x32xf32> to vector<8x32xf32>
    %266 = arith.addf %262, %265 : vector<8x32xf32>
    %267 = arith.addf %237, %266 : vector<8x32xf32>
    %c1_118 = arith.constant 1 : index
    %c0_119 = arith.constant 0 : index
    %c0_120 = arith.constant 0 : index
    %268 = vector.load %arg13[%c1_118, %c0_119, %c0_120] : memref<2x2x32xf32, #tpu.memory_space<vmem>>, vector<1x2x32xf32>
    %269 = vector.shape_cast %268 : vector<1x2x32xf32> to vector<2x32xf32>
    %270 = vector.extract_strided_slice %269 {offsets = [0, 0], sizes = [1, 32], strides = [1, 1]} : vector<2x32xf32> to vector<1x32xf32>
    %271 = vector.extract_strided_slice %269 {offsets = [1, 0], sizes = [1, 32], strides = [1, 1]} : vector<2x32xf32> to vector<1x32xf32>
    %cst_121 = arith.constant dense<0.000000e+00> : vector<8xf32>
    %272 = vector.multi_reduction <add>, %267, %cst_121 [1] : vector<8x32xf32> to vector<8xf32>
    %273 = vector.shape_cast %272 : vector<8xf32> to vector<8x1xf32>
    %cst_122 = arith.constant 3.200000e+01 : f32
    %274 = vector.broadcast %cst_122 : f32 to vector<8x1xf32>
    %275 = arith.divf %273, %274 : vector<8x1xf32>
    %276 = vector.broadcast %275 : vector<8x1xf32> to vector<8x32xf32>
    %277 = arith.subf %267, %276 : vector<8x32xf32>
    %278 = vector.broadcast %275 : vector<8x1xf32> to vector<8x32xf32>
    %279 = arith.subf %267, %278 : vector<8x32xf32>
    %280 = arith.mulf %277, %279 : vector<8x32xf32>
    %cst_123 = arith.constant dense<0.000000e+00> : vector<8xf32>
    %281 = vector.multi_reduction <add>, %280, %cst_123 [1] : vector<8x32xf32> to vector<8xf32>
    %282 = vector.shape_cast %281 : vector<8xf32> to vector<8x1xf32>
    %cst_124 = arith.constant 3.200000e+01 : f32
    %283 = vector.broadcast %cst_124 : f32 to vector<8x1xf32>
    %284 = arith.divf %282, %283 : vector<8x1xf32>
    %285 = vector.broadcast %275 : vector<8x1xf32> to vector<8x32xf32>
    %286 = arith.subf %267, %285 : vector<8x32xf32>
    %cst_125 = arith.constant 9.99999996E-13 : f32
    %287 = vector.broadcast %cst_125 : f32 to vector<8x1xf32>
    %288 = arith.addf %284, %287 : vector<8x1xf32>
    %289 = math.rsqrt %288 : vector<8x1xf32>
    %290 = vector.broadcast %289 : vector<8x1xf32> to vector<8x32xf32>
    %291 = arith.mulf %286, %290 : vector<8x32xf32>
    %292 = vector.broadcast %270 : vector<1x32xf32> to vector<8x32xf32>
    %293 = arith.mulf %291, %292 : vector<8x32xf32>
    %294 = vector.broadcast %271 : vector<1x32xf32> to vector<8x32xf32>
    %295 = arith.addf %293, %294 : vector<8x32xf32>
    %cst_126 = arith.constant dense<0.000000e+00> : vector<32xf32>
    %296 = vector.multi_reduction <add>, %165, %cst_126 [0] : vector<8x32xf32> to vector<32xf32>
    %297 = vector.shape_cast %296 : vector<32xf32> to vector<1x32xf32>
    %cst_127 = arith.constant 8.000000e+00 : f32
    %298 = vector.broadcast %cst_127 : f32 to vector<1x32xf32>
    %299 = arith.divf %297, %298 : vector<1x32xf32>
    %cst_128 = arith.constant dense<0.000000e+00> : vector<32xf32>
    %300 = vector.multi_reduction <add>, %295, %cst_128 [0] : vector<8x32xf32> to vector<32xf32>
    %301 = vector.shape_cast %300 : vector<32xf32> to vector<1x32xf32>
    %cst_129 = arith.constant 8.000000e+00 : f32
    %302 = vector.broadcast %cst_129 : f32 to vector<1x32xf32>
    %303 = arith.divf %301, %302 : vector<1x32xf32>
    %304 = arith.addf %299, %303 : vector<1x32xf32>
    %cst_130 = arith.constant 5.000000e-01 : f32
    %305 = vector.broadcast %cst_130 : f32 to vector<1x32xf32>
    %306 = arith.mulf %305, %304 : vector<1x32xf32>
    %c0_131 = arith.constant 0 : index
    %c0_132 = arith.constant 0 : index
    %c0_133 = arith.constant 0 : index
    %307 = vector.load %arg14[%c0_131, %c0_132, %c0_133] : memref<1x1x32xf32, #tpu.memory_space<vmem>>, vector<1x1x32xf32>
    %308 = vector.shape_cast %307 : vector<1x1x32xf32> to vector<1x32xf32>
    %309 = vector.shape_cast %306 : vector<1x32xf32> to vector<1x1x32xf32>
    tpu.vector_store %arg14[%c0_131, %c0_132, %c0_133], %309 {strides = array<i32>} : memref<1x1x32xf32, #tpu.memory_space<vmem>>, vector<1x1x32xf32>,
    return
  }
  func.func @transform_0(%arg0: i32) -> (i32, i32, i32) {
    %c0_i32 = arith.constant 0 : i32
    %c0_i32_0 = arith.constant 0 : i32
    %c0_i32_1 = arith.constant 0 : i32
    return %arg0, %c0_i32, %c0_i32_0 : i32, i32, i32
  }
  func.func @transform_1(%arg0: i32) -> (i32, i32, i32) {
    %c0_i32 = arith.constant 0 : i32
    %c0_i32_0 = arith.constant 0 : i32
    %c0_i32_1 = arith.constant 0 : i32
    return %arg0, %c0_i32, %c0_i32_0 : i32, i32, i32
  }
  func.func @transform_2(%arg0: i32) -> (i32, i32) {
    %c0_i32 = arith.constant 0 : i32
    %c0_i32_0 = arith.constant 0 : i32
    %c0_i32_1 = arith.constant 0 : i32
    return %c0_i32, %c0_i32_0 : i32, i32
  }
  func.func @transform_3(%arg0: i32) -> (i32, i32, i32, i32) {
    %c0_i32 = arith.constant 0 : i32
    %c0_i32_0 = arith.constant 0 : i32
    %c0_i32_1 = arith.constant 0 : i32
    %c0_i32_2 = arith.constant 0 : i32
    %c0_i32_3 = arith.constant 0 : i32
    return %c0_i32, %c0_i32_0, %c0_i32_1, %c0_i32_2 : i32, i32, i32, i32
  }
  func.func @transform_4(%arg0: i32) -> (i32, i32, i32, i32) {
    %c0_i32 = arith.constant 0 : i32
    %c0_i32_0 = arith.constant 0 : i32
    %c0_i32_1 = arith.constant 0 : i32
    %c0_i32_2 = arith.constant 0 : i32
    %c0_i32_3 = arith.constant 0 : i32
    return %c0_i32, %c0_i32_0, %c0_i32_1, %c0_i32_2 : i32, i32, i32, i32
  }
  func.func @transform_5(%arg0: i32) -> (i32, i32, i32, i32) {
    %c0_i32 = arith.constant 0 : i32
    %c0_i32_0 = arith.constant 0 : i32
    %c0_i32_1 = arith.constant 0 : i32
    %c0_i32_2 = arith.constant 0 : i32
    %c0_i32_3 = arith.constant 0 : i32
    return %c0_i32, %c0_i32_0, %c0_i32_1, %c0_i32_2 : i32, i32, i32, i32
  }
  func.func @transform_6(%arg0: i32) -> (i32, i32, i32) {
    %c0_i32 = arith.constant 0 : i32
    %c0_i32_0 = arith.constant 0 : i32
    %c0_i32_1 = arith.constant 0 : i32
    %c0_i32_2 = arith.constant 0 : i32
    return %c0_i32, %c0_i32_0, %c0_i32_1 : i32, i32, i32
  }
  func.func @transform_7(%arg0: i32) -> (i32, i32, i32) {
    %c0_i32 = arith.constant 0 : i32
    %c0_i32_0 = arith.constant 0 : i32
    %c0_i32_1 = arith.constant 0 : i32
    %c0_i32_2 = arith.constant 0 : i32
    return %c0_i32, %c0_i32_0, %c0_i32_1 : i32, i32, i32
  }
  func.func @transform_8(%arg0: i32) -> (i32, i32, i32) {
    %c0_i32 = arith.constant 0 : i32
    %c0_i32_0 = arith.constant 0 : i32
    %c0_i32_1 = arith.constant 0 : i32
    %c0_i32_2 = arith.constant 0 : i32
    return %c0_i32, %c0_i32_0, %c0_i32_1 : i32, i32, i32
  }
  func.func @transform_9(%arg0: i32) -> (i32, i32, i32) {
    %c0_i32 = arith.constant 0 : i32
    %c0_i32_0 = arith.constant 0 : i32
    %c0_i32_1 = arith.constant 0 : i32
    %c0_i32_2 = arith.constant 0 : i32
    return %c0_i32, %c0_i32_0, %c0_i32_1 : i32, i32, i32
  }
  func.func @transform_10(%arg0: i32) -> (i32, i32, i32) {
    %c0_i32 = arith.constant 0 : i32
    %c0_i32_0 = arith.constant 0 : i32
    %c0_i32_1 = arith.constant 0 : i32
    %c0_i32_2 = arith.constant 0 : i32
    return %c0_i32, %c0_i32_0, %c0_i32_1 : i32, i32, i32
  }
  func.func @transform_11(%arg0: i32) -> (i32, i32, i32) {
    %c0_i32 = arith.constant 0 : i32
    %c0_i32_0 = arith.constant 0 : i32
    %c0_i32_1 = arith.constant 0 : i32
    %c0_i32_2 = arith.constant 0 : i32
    return %c0_i32, %c0_i32_0, %c0_i32_1 : i32, i32, i32
  }
  func.func @transform_12(%arg0: i32) -> (i32, i32, i32) {
    %c0_i32 = arith.constant 0 : i32
    %c0_i32_0 = arith.constant 0 : i32
    %c0_i32_1 = arith.constant 0 : i32
    %c0_i32_2 = arith.constant 0 : i32
    return %c0_i32, %c0_i32_0, %c0_i32_1 : i32, i32, i32
  }
  func.func @transform_13(%arg0: i32) -> (i32, i32, i32) {
    %c0_i32 = arith.constant 0 : i32
    %c0_i32_0 = arith.constant 0 : i32
    %c0_i32_1 = arith.constant 0 : i32
    return %arg0, %c0_i32, %c0_i32_0 : i32, i32, i32
  }
}

</mosaic_0001>

<bundles_post_ra>
// kernel: _forward.1
= control target key start
LH: loop header
LB: loop body
LE: loop exit
PB: predicated region body
PF: predicated region fallthrough
CT: control target
= control target key end

     0   :  { %s2867_s0 = inlined_call_operand.vmem [shape: f32[2,8,32], index: 0, kind: input, shape index: {}]   ;;  %s2868_s1 = inlined_call_operand.vmem [shape: f32[2,1,8], index: 1, kind: input, shape index: {}]   ;;  %s2869_s2 = inlined_call_operand.vmem [shape: f32[2,32], index: 2, kind: input, shape index: {}]   ;;  %s2870_s3 = inlined_call_operand.vmem [shape: bf16[2,2,32,48], index: 3, kind: input, shape index: {}]   ;;  %s2871_s4 = inlined_call_operand.vmem [shape: f32[2,2,1,48], index: 4, kind: input, shape index: {}]   ;;  %s2872_s5 = inlined_call_operand.vmem [shape: bf16[2,2,16,32], index: 5, kind: input, shape index: {}]   ;;  %s2873_s6 = inlined_call_operand.vmem [shape: f32[2,1,32], index: 6, kind: input, shape index: {}]   ;;  %s2874_s7 = inlined_call_operand.vmem [shape: f32[2,2,32], index: 7, kind: input, shape index: {}]   ;;  %s2875_s8 = inlined_call_operand.vmem [shape: bf16[2,32,64], index: 8, kind: input, shape index: {}]   ;;  %s2876_s9 = inlined_call_operand.vmem [shape: f32[2,1,64], index: 9, kind: input, shape index: {}]   ;;  %s2877_s10 = inlined_call_operand.vmem [shape: bf16[2,64,32], index: 10, kind: input, shape index: {}]   ;;  %s2878_s11 = inlined_call_operand.vmem [shape: f32[2,1,32], index: 11, kind: input, shape index: {}]   ;;  %s2879_s12 = inlined_call_operand.vmem [shape: f32[2,2,32], index: 12, kind: input, shape index: {}]   ;;  %s2880_s13 = inlined_call_operand.hbm [shape: f32[2,1,32], index: 13, kind: output, shape index: {}]  }
   0x1   :  { %2885 = sst [smem:[#allocation5_spill]] %s2867_s0 }
   0x2   :  { %2886 = sst [smem:[#allocation6_spill]] %s2868_s1 }
   0x3   :  { %2887 = sst [smem:[#allocation7_spill]] %s2869_s2 }
   0x4   :  { %18 = vsyncpa [#allocation3], 0 }
   0x5   :  { %20 = vsyncpa [#allocation3 + $0x1], 0  ;;  %s2479_s25 = smov 0   ;;  %s2481_s26 = smov 0  }
   0x6   :  { %s2483_s27 = smov 0   ;;  %s2485_s28 = smov 0  }
   0x7 LB: > { %s2500_s29 = sadd.s32 4294967295, %s2402_s28   ;;  %s1954_s30 = sadd.s32 4294967294, %s2402_s28   ;;  %s2402_s28 = sphi %s2485_s28, %s2898_s28   ;;  %s2398_s27 = sphi %s2483_s27, %s2897_s27   ;;  %s2394_s26 = sphi %s2481_s26, %s2896_s26   ;;  %s2390_s25 = sphi %s2479_s25, %s2895_s25  }
   0x8   : > { %s2504_s14 = sadd.s32 1, %s2402_s28   ;;  %s316_s15 = sadd.s32 1, %s2398_s27 }
   0x9   : > { %s313_s16 = ssub.s32 %s2402_s28, %s2504_s14  ;;  %p326_p0 = scmp.ne.s32.totalorder %s2398_s27, %s2394_s26 }
   0xa   : > { %p314_p1 = scmp.eq.s32.totalorder %s313_s16, 0  ;;  %p327_p2 = scmp.eq.s32.totalorder %s2500_s29, 1 }
   0xb   : > { %p332_p3 = scmp.ne.s32.totalorder %s2394_s26, %s2390_s25  ;;  %p333_p4 = scmp.eq.s32.totalorder %s1954_s30, 1 }
   0xc   : > { %s2515_s17 = scalar_select %p314_p1, %s2398_s27, %s316_s15  }
   0xd   : > { %p2517_p5 = por %p327_p2, %p326_p0  ;;  %p2521_p6 = por %p333_p4, %p332_p3 }
   0xe   : > { %p1957_p7 = scmp.ge.s32.totalorder %s2402_s28, 1  ;;  %p397_p8 = scmp.lt.s32.totalorder %s2402_s28, 3 }
  0x10   : > { %p398_p9 = pnand %p1957_p7, %p397_p8 }
  0x11   : > { %p442_p10 = scmp.lt.s32.totalorder (!%p398_p9), %s2500_s29, 1  ;;  %vm455_vm0 = vcmask (!%p398_p9), 261120   ;;  %s2890_s0 = sld [smem:[#allocation5_spill]] (!%p398_p9)  ;;  %v2286_v7 = vld [vmem:[%s2870_s3] sm:$0xff] (!%p398_p9)   ;;  %v2404_v8 = vmov (!%p398_p9), 0.0   ;;  %v2287_v9 = vld [vmem:[%s2870_s3 + $0x8] sm:$0xff] (!%p398_p9)   ;;  %v470_v12 = vlaneseq (!%p398_p9) }
  0x12   : > { %401 = sbr.rel (%p398_p9) target bundleno = 5174 (0x1436), region = 72  ;;  %2099 = vmatprep.subr.bf16.mxu1 (!%p398_p9), %v2404_v8  ;;  %2115 = vmatprep.subr.bf16.mxu0 (!%p398_p9), %v2404_v8  ;;  %vm2405_vm1 = vmmov (!%p398_p9), 0   ;;  %s2891_s2 = sld [smem:[#allocation7_spill]] (!%p398_p9)  ;;  %v2288_v24 = vld [vmem:[%s2870_s3 + $0x10] sm:$0xff] (!%p398_p9)   ;;  %v2289_v26 = vld [vmem:[%s2870_s3 + $0x18] sm:$0xff] (!%p398_p9)   ;;  %vm615_vm2 = vcmask (!%p398_p9), 130048  }
  0x13   : > { %2100 = vmatpush3.bf16.msra.mxu1 (!%p398_p9), %v2286_v7  ;;  %2103 = vmatprep.mubr.msk.bf16.mxu1 (!%p398_p9), %vm2405_vm1, %v2404_v8  ;;  %v471_v14 = vshrl.u32 (!%p398_p9), %v470_v12, 7  ;;  %v1959_v27 = vld [vmem:[%s2871_s4] ss:$0 sm:$0xff] (!%p398_p9)  ;;  %s2883_s23 = smov (!%p398_p9), 112   ;;  %v1960_v34 = vld [vmem:[%s2871_s4 + $0x1] ss:$0 sm:$0xff] (!%p398_p9) }
  0x14   : > { %2101 = vmatprep.subr.bf16.mxu1 (!%p398_p9), %v2404_v8  ;;  %2117 = vmatprep.mubr.msk.bf16.mxu0 (!%p398_p9), %vm2405_vm1, %v2404_v8  ;;  %s2892_s1 = sld [smem:[#allocation6_spill]] (!%p398_p9)  ;;  %vm721_vm3 = vcmask (!%p398_p9), 64512   ;;  %vm751_vm4 = vcmask (!%p398_p9), 1043456   ;;  %vm1099_vm5 = vcmask (!%p398_p9), 523264   ;;  %s2893_s22 = smov (!%p398_p9), 112   ;;  %vm1875_vm6 = vcmask (!%p398_p9), 253952  }
  0x15   : > { %v2551_v15 = vsub.s32 (!%p398_p9), 0, %v471_v14  ;;  %v2556_v17 = vsub.s32 (!%p398_p9), 1, %v471_v14  ;;  %s440_s16 = sand.u32 (!%p398_p9), 1, %s2394_s26  }
  0x16   : > { %s1878_s15 = scalar_lea.sflag (!%p398_p9), [#allocation3], %s440_s16 }
  0x17   : > { %2102 = vmatpush3.bf16.msra.mxu1 (!%p398_p9), %v2287_v9 }
  0x18   : > { %2107 = vmatprep.subr.bf16.mxu1 (!%p398_p9), %v2404_v8  ;;  %v454_v16 = vld [vmem:[%s2891_s2] sm:$0x3] (!%p398_p9) }
  0x19   : > { %s2529_s20 = scalar_select %p442_p10, %s2500_s29, 1  ;;  %v473_v18 = vrot.slane %v454_v16, %v2551_v15  ;;  %v478_v21 = vrot.slane %v454_v16, %v2556_v17 }
  0x1b   : > { %s1958_s21 = sshll.u32 %s2529_s20, 3 }
  0x1c   : > { %s445_s24 = scalar_lea.vmem %s2890_s0, %s1958_s21  ;;  %s448_s21 = scalar_lea.vmem %s2892_s1, %s2529_s20 }
  0x1d   : > { %v453_v0 = vld [vmem:[%s445_s24] sm:$0xff]  ;;  %s2881_s20 = smov 96  }
  0x1e   : > { %v456_v1 = vsel %vm455_vm0, %v453_v0, 0.0  ;;  %v450_v45 = vld [vmem:[%s448_s21] sm:$0x1]  ;;  %s2044_s21 = sshll.u32 %s2500_s29, 4  ;;  %s2408_s29 = smov [#allocation2]  }
  0x1f   : > { %457 = vadd.xlane.f32.xlu0 %v456_v1  ;;  %v451_v46 = vsub.f32 1.0, %v450_v45  ;;  %s2825_s30 = scalar_lea.hbm %s2880_s13, %s2044_s21  ;;  %s2344_s1 = sshll.u32 %s2408_s29, 4  ;;  %s2345_s1 = int_to_ptr.vmem [resolvable:$false] %s2344_s1 }
  0x20   : > { %s2346_s2 = scalar_lea.vmem %s2345_s1, 32 }
  0x21   : > { %v452_v47 = vmul.f32 -10000.0, %v451_v46 }
  0x23   : > { %v2601_v48 = vrot.slane %v452_v47, %v2551_v15 }
  0xac   : > { %v458_v2 = vpop.xlane.xlu0 %457 }
  0xad   : > { %v460_v3 = vmul.f32 0.03125, %v458_v2 }
  0xaf   : > { %v461_v4 = vsub.f32 %v453_v0, %v460_v3 }
  0xb1   : > { %v462_v5 = vmul.f32 %v461_v4, %v461_v4 }
  0xb3   : > { %v463_v6 = vsel %vm455_vm0, %v462_v5, 0.0 }
  0xb4   : > { %464 = vadd.xlane.f32.xlu0 %v463_v6 }
 0x141   : > { %v465_v10 = vpop.xlane.xlu0 %464 }
 0x142   : > { %v466_v11 = vmul.f32 0.03125, %v465_v10 }
 0x144   : > { %v467_v13 = vadd.f32 1e-12, %v466_v11 }
 0x146   : > { %2310 = vrsqrt.f32 %v467_v13 }
 0x150   : > { %v2311_v19 = vpop.eup %2310 }
 0x151   : > { %v469_v20 = vmul.f32 %v2311_v19, %v461_v4 }
 0x153   : > { %v474_v22 = vmul.f32 %v473_v18, %v469_v20 }
 0x155   : > { %v2560_v23 = vadd.f32 %v478_v21, %v474_v22 }
 0x157   : > { %v480_v25 = vpack.c.bf16 %v2560_v23, %v2560_v23 }
 0x159   : > { %2104 = vmatmul.mubr.msk.bf16.vlgmr.msra.gmra.mrb[0].mxu1 %vm455_vm0, %v480_v25 }
 0x15a   : > { %2108 = vmatpush3.bf16.msra.mxu1 %v2288_v24  ;;  %2111 = vmatprep.mubr.msk.bf16.mxu1 %vm2405_vm1, %v2404_v8 }
 0x15b   : > { %2109 = vmatprep.subr.bf16.mxu1 %v2404_v8 }
 0x15e   : > { %2110 = vmatpush3.bf16.msra.mxu1 %v2289_v26  ;;  %v2291_v26 = vld [vmem:[%s2872_s5 + $0x8] sm:$0xff]  }
 0x15f   : > { %2121 = vmatprep.subr.bf16.mxu1 %v2404_v8 }
 0x161   : > { %2112 = vmatmul.mubr.msk.bf16.vlgmr.msra.gmra.mrb[4].mxu1 %vm455_vm0, %v480_v25  ;;  %v2290_v25 = vld [vmem:[%s2872_s5] sm:$0xff]  }
 0x162   : > { %2123 = vmatprep.mubr.msk.bf16.mxu1 %vm2405_vm1, %v2404_v8 }
 0x22c   : > { %v552_v28 = vpop.f32.mrb[0].mxu1 }
 0x22d   : > { %v553_v29 = vadd.f32 %v1959_v27, %v552_v28  ;;  %v2105_v30 = vpop.f32.mrb[1].mxu1 }
 0x22e   : > { %v555_v31 = vpop.f32.mrb[2].mxu1 }
 0x22f   : > { %v610_v32 = vpack.c.bf16 %v553_v29, %v553_v29  ;;  %v2106_v33 = vpop.f32.mrb[3].mxu1 }
 0x231   : > { %613 = vrot.lane.b32.xlu1 %v610_v32, %s2883_s23 }
 0x234   : > { %v604_v35 = vpop.f32.mrb[4].mxu1 }
 0x235   : > { %v605_v36 = vadd.f32 %v1960_v34, %v604_v35  ;;  %v2113_v37 = vpop.f32.mrb[5].mxu1 }
 0x236   : > { %v607_v38 = vpop.f32.mrb[6].mxu1 }
 0x237   : > { %v611_v39 = vpack.c.bf16 %v605_v36, %v605_v36  ;;  %v2114_v40 = vpop.f32.mrb[7].mxu1 }
 0x239   : > { %663 = vrot.lane.b32.xlu1 %v611_v39, %s2883_s23 }
 0x2a3   : > { %v614_v41 = vpop.permute.xlu1 %613 }
 0x2a4   : > { %v620_v42 = vsel %vm615_vm2, %v614_v41, 0 }
 0x2a5   : > { %2116 = vmatpush3.bf16.xpose.msra.mxu0 %v620_v42 }
 0x2a6   : > { %2127 = vmatprep.subr.bf16.mxu0 %v2404_v8 }
 0x2ab   : > { %v664_v43 = vpop.permute.xlu1 %663 }
 0x2ac   : > { %v669_v44 = vsel %vm615_vm2, %v664_v43, 0  ;;  %2118 = vmatmul.mubr.msk.bf16.vlgmr.msra.gmra.mrb[0].mxu0 %vm615_vm2, %v610_v32 }
 0x2ad   : > { %2122 = vmatpush3.bf16.xpose.msra.mxu1 %v669_v44  ;;  %2129 = vmatprep.mubr.msk.bf16.mxu0 %vm2405_vm1, %v2404_v8  ;;  %v1975_v44 = vld [vmem:[%s2873_s6] ss:$0 sm:$0xff] }
 0x2ae   : > { %2133 = vmatprep.subr.bf16.mxu1 %v2404_v8 }
 0x2b4   : > { %2124 = vmatmul.mubr.msk.bf16.vlgmr.msra.gmra.mrb[8].mxu1 %vm615_vm2, %v611_v39 }
 0x2b5   : > { %2135 = vmatprep.mubr.msk.bf16.mxu1 %vm2405_vm1, %v2404_v8 }
 0x37f   : > { %v656_v49 = vpop.f32.mrb[0].mxu0 }
 0x380   : > { %v711_v50 = vmul.f32 0.25, %v656_v49  ;;  %v2119_v51 = vpop.f32.mrb[1].mxu0 }
 0x381   : > { %v659_v52 = vpop.f32.mrb[2].mxu0 }
 0x382   : > { %v2120_v53 = vpop.f32.mrb[3].mxu0  ;;  %v719_v54 = vadd.f32 %v2601_v48, %v711_v50 }
 0x384   : > { %v722_v55 = vsel %vm721_vm3, %v719_v54, -inf }
 0x385   : > { %723 = vmax.xlane.f32.xlu0 %v722_v55 }
 0x387   : > { %v705_v56 = vpop.f32.mrb[8].mxu1 }
 0x388   : > { %v712_v57 = vmul.f32 0.25, %v705_v56  ;;  %v2125_v58 = vpop.f32.mrb[9].mxu1 }
 0x389   : > { %v708_v59 = vpop.f32.mrb[10].mxu1  ;;  %v2292_v58 = vld [vmem:[%s2875_s8] sm:$0xff]  }
 0x38a   : > { %v2126_v60 = vpop.f32.mrb[11].mxu1  ;;  %v720_v61 = vadd.f32 %v2601_v48, %v712_v57 }
 0x38c   : > { %v725_v62 = vsel %vm721_vm3, %v720_v61, -inf }
 0x38d   : > { %726 = vmax.xlane.f32.xlu1 %v725_v62  ;;  %v959_v62 = vld [vmem:[%s2874_s7] sm:$0x3] }
 0x39b   : > { %746 = vrot.lane.b32.xlu0 %v610_v32, %s2881_s20 }
 0x412   : > { %v724_v63 = vpop.xlane.xlu0 %723 }
 0x413   : > { %v728_v0 = vsub.f32 %v719_v54, %v724_v63  ;;  %v976_v63 = vrot.slane %v959_v62, %v2551_v15 }
 0x415   : > { %v730_v1 = vmul.f32 1.442695, %v728_v0 }
 0x416   : > { %v747_v2 = vpop.permute.xlu0 %746 }
 0x417   : > { %2312 = vpow2.f32 %v730_v1  ;;  %v753_v3 = vsel %vm751_vm4, %v747_v2, 0  ;;  %v981_v2 = vrot.slane %v959_v62, %v2556_v17 }
 0x418   : > { %2128 = vmatpush3.bf16.msra.mxu0 %v753_v3 }
 0x419   : > { %2139 = vmatprep.subr.bf16.mxu0 %v2404_v8 }
 0x41a   : > { %v727_v4 = vpop.xlane.xlu1 %726 }
 0x41b   : > { %v729_v5 = vsub.f32 %v720_v61, %v727_v4 }
 0x41d   : > { %v732_v6 = vmul.f32 1.442695, %v729_v5 }
 0x41f   : > { %2314 = vpow2.f32 %v732_v6  ;;  %v2294_v6 = vld [vmem:[%s2877_s10] sm:$0xff]  }
 0x421   : > { %v2313_v7 = vpop.eup %2312 }
 0x422   : > { %v734_v9 = vsel %vm721_vm3, %v2313_v7, 0.0 }
 0x423   : > { %735 = vadd.xlane.f32.xlu0 %v734_v9  ;;  %v2296_v9 = vld [vmem:[%s2877_s10 + $0x10] sm:$0xff]  }
 0x429   : > { %v2315_v10 = vpop.eup %2314 }
 0x42a   : > { %v737_v11 = vsel %vm721_vm3, %v2315_v10, 0.0 }
 0x42b   : > { %738 = vadd.xlane.f32.xlu0 %v737_v11  ;;  %v1976_v11 = vld [vmem:[%s2876_s9] ss:$0 sm:$0xff] }
 0x441   : > { %795 = vrot.lane.b32.xlu0 %v611_v39, %s2881_s20  ;;  %s2894_s20 = smov 96  }
 0x4b0   : > { %v736_v12 = vpop.xlane.xlu0 %735 }
 0x4b1   : > { %2316 = vrcp.f32 %v736_v12 }
 0x4b8   : > { %v739_v13 = vpop.xlane.xlu0 %738 }
 0x4b9   : > { %2318 = vrcp.f32 %v739_v13 }
 0x4bb   : > { %v2317_v14 = vpop.eup %2316 }
 0x4bc   : > { %v742_v16 = vmul.f32 %v2317_v14, %v2313_v7  ;;  %v796_v18 = vpop.permute.xlu0 %795  ;;  %v2295_v7 = vld [vmem:[%s2877_s10 + $0x8] sm:$0xff]  }
 0x4bd   : > { %v801_v19 = vsel %vm751_vm4, %v796_v18, 0 }
 0x4be   : > { %2134 = vmatpush3.bf16.msra.mxu1 %v801_v19  ;;  %v744_v20 = vpack.c.bf16 %v742_v16, %v742_v16 }
 0x4bf   : > { %2145 = vmatprep.subr.bf16.mxu1 %v2404_v8 }
 0x4c0   : > { %2130 = vmatmul.mubr.msk.bf16.vlgmr.msra.gmra.mrb[4].mxu0 %vm721_vm3, %v744_v20 }
 0x4c1   : > { %2141 = vmatprep.mubr.msk.bf16.mxu0 %vm2405_vm1, %v2404_v8  ;;  %2140 = vmatpush3.bf16.msra.mxu0 %v2290_v25 }
 0x4c2   : > { %2151 = vmatprep.subr.bf16.mxu0 %v2404_v8 }
 0x4c3   : > { %v2319_v21 = vpop.eup %2318 }
 0x4c4   : > { %v743_v22 = vmul.f32 %v2319_v21, %v2315_v10  ;;  %v2297_v10 = vld [vmem:[%s2877_s10 + $0x18] sm:$0xff]  }
 0x4c6   : > { %v745_v24 = vpack.c.bf16 %v743_v22, %v743_v22 }
 0x4c8   : > { %2136 = vmatmul.mubr.msk.bf16.vlgmr.msra.gmra.mrb[12].mxu1 %vm721_vm3, %v745_v24 }
 0x4c9   : > { %2147 = vmatprep.mubr.msk.bf16.mxu1 %vm2405_vm1, %v2404_v8  ;;  %2146 = vmatpush3.bf16.msra.mxu1 %v2291_v26 }
 0x4ca   : > { %2159 = vmatprep.subr.bf16.mxu1 %v2404_v8 }
 0x593   : > { %v789_v27 = vpop.f32.mrb[4].mxu0 }
 0x594   : > { %v843_v28 = vpack.c.bf16 %v789_v27, %v789_v27  ;;  %v2131_v29 = vpop.f32.mrb[5].mxu0 }
 0x595   : > { %v792_v30 = vpop.f32.mrb[6].mxu0 }
 0x596   : > { %v2132_v31 = vpop.f32.mrb[7].mxu0  ;;  %2142 = vmatmul.mubr.msk.bf16.vlgmr.msra.gmra.mrb[8].mxu0 %vm615_vm2, %v843_v28  ;;  %v1980_v30 = vld [vmem:[%s2878_s11] ss:$0 sm:$0xff] }
 0x597   : > { %2155 = vmatprep.mubr.msk.bf16.mxu0 %vm2405_vm1, %v2404_v8  ;;  %2152 = vmatpush3.bf16.msra.mxu0 %v2292_v58  ;;  %v2301_v58 = vld [vmem:[%s2870_s3 + $0x38] sm:$0xff]  }
 0x598   : > { %2153 = vmatprep.subr.bf16.mxu0 %v2404_v8 }
 0x59b   : > { %v837_v32 = vpop.f32.mrb[12].mxu1 }
 0x59c   : > { %v844_v33 = vpack.c.bf16 %v837_v32, %v837_v32  ;;  %v2137_v34 = vpop.f32.mrb[13].mxu1 }
 0x59d   : > { %v840_v35 = vpop.f32.mrb[14].mxu1 }
 0x59e   : > { %v2138_v36 = vpop.f32.mrb[15].mxu1  ;;  %2148 = vmatmul.mubr.msk.bf16.vlgmr.msra.gmra.mrb[16].mxu1 %vm615_vm2, %v844_v33 }
 0x59f   : > { %2167 = vmatprep.mubr.msk.bf16.mxu1 %vm2405_vm1, %v2404_v8  ;;  %2160 = vmatpush3.bf16.msra.mxu1 %v2294_v6 }
 0x5a0   : > { %2161 = vmatprep.subr.bf16.mxu1 %v2404_v8 }
 0x5a3   : > { %2162 = vmatpush3.bf16.msra.mxu1 %v2295_v7 }
 0x5a4   : > { %2163 = vmatprep.subr.bf16.mxu1 %v2404_v8 }
 0x5a7   : > { %2164 = vmatpush3.bf16.msra.mxu1 %v2296_v9 }
 0x5a8   : > { %2165 = vmatprep.subr.bf16.mxu1 %v2404_v8 }
 0x5ab   : > { %2166 = vmatpush3.bf16.msra.mxu1 %v2297_v10 }
 0x5ac   : > { %2187 = vmatprep.subr.bf16.mxu1 %v2404_v8 }
 0x669   : > { %v892_v37 = vpop.f32.mrb[8].mxu0 }
 0x66a   : > { %v2143_v38 = vpop.f32.mrb[9].mxu0  ;;  %v947_v42 = vsel %vm455_vm0, %v892_v37, 0.0 }
 0x66b   : > { %v895_v39 = vpop.f32.mrb[10].mxu0 }
 0x66c   : > { %v2144_v40 = vpop.f32.mrb[11].mxu0 }
 0x671   : > { %v941_v41 = vpop.f32.mrb[16].mxu1 }
 0x672   : > { %v948_v43 = vsel %vm455_vm0, %v941_v41, 0.0  ;;  %v2149_v45 = vpop.f32.mrb[17].mxu1 }
 0x673   : > { %v949_v46 = vadd.f32 %v948_v43, %v947_v42  ;;  %v944_v47 = vpop.f32.mrb[18].mxu1  ;;  %v2298_v43 = vld [vmem:[%s2870_s3 + $0x20] sm:$0xff]  }
 0x674   : > { %v2150_v49 = vpop.f32.mrb[19].mxu1 }
 0x675   : > { %v957_v50 = vadd.f32 %v1975_v44, %v949_v46  ;;  %v2299_v44 = vld [vmem:[%s2870_s3 + $0x28] sm:$0xff]   ;;  %v1144_v49 = vld [vmem:[%s2879_s12] sm:$0x3] }
 0x677   : > { %v958_v51 = vadd.f32 %v957_v50, %v2560_v23  ;;  %v2293_v23 = vld [vmem:[%s2875_s8 + $0x8] sm:$0xff]   ;;  %v1161_v50 = vrot.slane %v1144_v49, %v2551_v15 }
 0x678   : > { %2154 = vmatpush3.bf16.msra.mxu0 %v2293_v23  ;;  %v1996_v23 = vld [vmem:[%s2871_s4 + $0x2] ss:$0 sm:$0xff] }
 0x679   : > { %v960_v52 = vsel %vm455_vm0, %v958_v51, 0.0  ;;  %2171 = vmatprep.subr.bf16.mxu0 %v2404_v8 }
 0x67a   : > { %961 = vadd.xlane.f32.xlu1 %v960_v52 }
 0x707   : > { %v962_v53 = vpop.xlane.xlu1 %961 }
 0x708   : > { %v963_v54 = vmul.f32 0.03125, %v962_v53  ;;  %v1166_v53 = vrot.slane %v1144_v49, %v2556_v17 }
 0x70a   : > { %v964_v55 = vsub.f32 %v958_v51, %v963_v54 }
 0x70c   : > { %v965_v56 = vmul.f32 %v964_v55, %v964_v55 }
 0x70e   : > { %v966_v57 = vsel %vm455_vm0, %v965_v56, 0.0  ;;  %v2300_v56 = vld [vmem:[%s2870_s3 + $0x30] sm:$0xff]  }
 0x70f   : > { %967 = vadd.xlane.f32.xlu0 %v966_v57 }
 0x79c   : > { %v968_v59 = vpop.xlane.xlu0 %967 }
 0x79d   : > { %v969_v60 = vmul.f32 0.03125, %v968_v59 }
 0x79f   : > { %v970_v61 = vadd.f32 1e-12, %v969_v60 }
 0x7a1   : > { %2320 = vrsqrt.f32 %v970_v61 }
 0x7ab   : > { %v2321_v0 = vpop.eup %2320 }
 0x7ac   : > { %v972_v1 = vmul.f32 %v2321_v0, %v964_v55 }
 0x7ae   : > { %v977_v3 = vmul.f32 %v976_v63, %v972_v1  ;;  %v1997_v1 = vld [vmem:[%s2871_s4 + $0x3] ss:$0 sm:$0xff] }
 0x7b0   : > { %v982_v4 = vadd.f32 %v981_v2, %v977_v3 }
 0x7b2   : > { %v983_v5 = vpack.c.bf16 %v982_v4, %v982_v4 }
 0x7b4   : > { %2156 = vmatmul.mubr.msk.bf16.vlgmr.msra.gmra.mrb[12].mxu0 %vm455_vm0, %v983_v5 }
 0x7b5   : > { %2175 = vmatprep.mubr.msk.bf16.mxu0 %vm2405_vm1, %v2404_v8  ;;  %2172 = vmatpush3.bf16.msra.mxu0 %v2298_v43 }
 0x7b6   : > { %2173 = vmatprep.subr.bf16.mxu0 %v2404_v8 }
 0x7b9   : > { %2174 = vmatpush3.bf16.msra.mxu0 %v2299_v44 }
 0x7ba   : > { %2179 = vmatprep.subr.bf16.mxu0 %v2404_v8 }
 0x887   : > { %v1044_v12 = vpop.f32.mrb[12].mxu0 }
 0x888   : > { %v1045_v13 = vadd.f32 %v1976_v11, %v1044_v12  ;;  %v2157_v14 = vpop.f32.mrb[13].mxu0 }
 0x889   : > { %v1047_v16 = vpop.f32.mrb[14].mxu0 }
 0x88a   : > { %v1051_v18 = vmul.f32 0.044715, %v1045_v13  ;;  %v2158_v19 = vpop.f32.mrb[15].mxu0  ;;  %v1050_v26 = vmul.f32 0.5, %v1045_v13 }
 0x88c   : > { %v1052_v20 = vmul.f32 %v1051_v18, %v1045_v13 }
 0x88e   : > { %v1053_v21 = vmul.f32 %v1052_v20, %v1045_v13 }
 0x890   : > { %v1054_v22 = vadd.f32 %v1053_v21, %v1045_v13 }
 0x892   : > { %v1055_v24 = vmul.f32 0.7978846, %v1054_v22 }
 0x894   : > { %2322 = vtanh.f32 %v1055_v24 }
 0x89e   : > { %v2323_v25 = vpop.eup %2322 }
 0x89f   : > { %v1057_v27 = vadd.f32 1.0, %v2323_v25 }
 0x8a1   : > { %v1058_v28 = vmul.f32 %v1057_v27, %v1050_v26 }
 0x8a3   : > { %v1059_v29 = vpack.c.bf16 %v1058_v28, %v1058_v28 }
 0x8a5   : > { %2168 = vmatmul.mubr.msk.bf16.vlgmr.msra.gmra.mrb[20].mxu1 %vm1099_vm5, %v1059_v29 }
 0x8a6   : > { %2189 = vmatprep.mubr.msk.bf16.mxu1 %vm2405_vm1, %v2404_v8 }
 0x978   : > { %v1137_v31 = vpop.f32.mrb[20].mxu1 }
 0x979   : > { %v1138_v32 = vadd.f32 %v1980_v30, %v1137_v31  ;;  %v2169_v33 = vpop.f32.mrb[21].mxu1 }
 0x97a   : > { %v1140_v34 = vpop.f32.mrb[22].mxu1 }
 0x97b   : > { %v2170_v35 = vpop.f32.mrb[23].mxu1  ;;  %v1143_v36 = vadd.f32 %v1138_v32, %v982_v4 }
 0x97d   : > { %v1145_v37 = vsel %vm455_vm0, %v1143_v36, 0.0 }
 0x97e   : > { %1146 = vadd.xlane.f32.xlu1 %v1145_v37 }
 0xa0b   : > { %v1147_v38 = vpop.xlane.xlu1 %1146 }
 0xa0c   : > { %v1148_v39 = vmul.f32 0.03125, %v1147_v38 }
 0xa0e   : > { %v1149_v40 = vsub.f32 %v1143_v36, %v1148_v39 }
 0xa10   : > { %v1150_v41 = vmul.f32 %v1149_v40, %v1149_v40 }
 0xa12   : > { %v1151_v42 = vsel %vm455_vm0, %v1150_v41, 0.0 }
 0xa13   : > { %1152 = vadd.xlane.f32.xlu1 %v1151_v42 }
 0xaa0   : > { %v1153_v45 = vpop.xlane.xlu1 %1152 }
 0xaa1   : > { %v1154_v46 = vmul.f32 0.03125, %v1153_v45 }
 0xaa3   : > { %v1155_v47 = vadd.f32 1e-12, %v1154_v46 }
 0xaa5   : > { %2324 = vrsqrt.f32 %v1155_v47 }
 0xaaf   : > { %v2325_v51 = vpop.eup %2324 }
 0xab0   : > { %v1157_v52 = vmul.f32 %v2325_v51, %v1149_v40 }
 0xab2   : > { %v1162_v54 = vmul.f32 %v1161_v50, %v1157_v52  ;;  %v2302_v52 = vld [vmem:[%s2872_s5 + $0x10] sm:$0xff]  }
 0xab4   : > { %v2699_v55 = vadd.f32 %v1166_v53, %v1162_v54  ;;  %v2303_v53 = vld [vmem:[%s2872_s5 + $0x18] sm:$0xff]  }
 0xab6   : > { %v1168_v57 = vpack.c.bf16 %v2699_v55, %v2699_v55 }
 0xab8   : > { %2176 = vmatmul.mubr.msk.bf16.vlgmr.msra.gmra.mrb[16].mxu0 %vm455_vm0, %v1168_v57 }
 0xab9   : > { %2180 = vmatpush3.bf16.msra.mxu0 %v2300_v56  ;;  %2183 = vmatprep.mubr.msk.bf16.mxu0 %vm2405_vm1, %v2404_v8 }
 0xaba   : > { %2181 = vmatprep.subr.bf16.mxu0 %v2404_v8 }
 0xabd   : > { %2182 = vmatpush3.bf16.msra.mxu0 %v2301_v58 }
 0xabe   : > { %2193 = vmatprep.subr.bf16.mxu0 %v2404_v8 }
 0xac0   : > { %2184 = vmatmul.mubr.msk.bf16.vlgmr.msra.gmra.mrb[20].mxu0 %vm455_vm0, %v1168_v57 }
 0xac1   : > { %2195 = vmatprep.mubr.msk.bf16.mxu0 %vm2405_vm1, %v2404_v8 }
 0xb8b   : > { %v1242_v59 = vpop.f32.mrb[16].mxu0 }
 0xb8c   : > { %v1243_v60 = vadd.f32 %v1996_v23, %v1242_v59  ;;  %v2177_v61 = vpop.f32.mrb[17].mxu0 }
 0xb8d   : > { %v1245_v62 = vpop.f32.mrb[18].mxu0 }
 0xb8e   : > { %v1300_v63 = vpack.c.bf16 %v1243_v60, %v1243_v60  ;;  %v2178_v0 = vpop.f32.mrb[19].mxu0 }
 0xb90   : > { %1303 = vrot.lane.b32.xlu1 %v1300_v63, %s2893_s22 }
 0xb93   : > { %v1294_v2 = vpop.f32.mrb[20].mxu0 }
 0xb94   : > { %v1295_v3 = vadd.f32 %v1997_v1, %v1294_v2  ;;  %v2185_v4 = vpop.f32.mrb[21].mxu0 }
 0xb95   : > { %v1297_v5 = vpop.f32.mrb[22].mxu0 }
 0xb96   : > { %v1301_v6 = vpack.c.bf16 %v1295_v3, %v1295_v3  ;;  %v2186_v7 = vpop.f32.mrb[23].mxu0 }
 0xb97   : > { %v2017_v7 = vld [vmem:[%s2873_s6 + $0x1] ss:$0 sm:$0xff] }
 0xb98   : > { %1352 = vrot.lane.b32.xlu1 %v1301_v6, %s2893_s22  ;;  %s441_s22 = scalar_lea.vmem [#allocation2], %s440_s16 }
 0xb99   : > { %s1890_s24 = sshll.u32 %s441_s22, 4  ;;  %s2827_s24 = int_to_ptr.vmem [resolvable:$true] %s1890_s24 }
 0xb9a   : > { %s2340_s0 = scalar_lea.vmem %s2827_s24, 16  ;;  %p2347_p0 = scmp.lt.s32.totalorder %s2827_s24, %s2345_s1 }
 0xb9b   : > { %p2341_p11 = scmp.ne.s32.totalorder %s2827_s24, %s2340_s0  ;;  %p2348_p1 = scmp.lt.s32.totalorder %s2346_s2, %s2340_s0 }
 0xb9d   : > { %p2342_p12 = pnand %p2341_p11, %p2517_p5  ;;  %p2349_p2 = por %p2348_p1, %p2347_p0 }
 0xb9f   : > { %p2343_p13 = pneg %p2342_p12 }
 0xba1   : > { %p2350_p3 = pnand %p2349_p2, %p2343_p13 }
 0xc02   : > { %v1304_v9 = vpop.permute.xlu1 %1303 }
 0xc03   : > { %v1309_v10 = vsel %vm615_vm2, %v1304_v9, 0 }
 0xc04   : > { %2188 = vmatpush3.bf16.xpose.msra.mxu1 %v1309_v10 }
 0xc05   : > { %2199 = vmatprep.subr.bf16.mxu1 %v2404_v8 }
 0xc0a   : > { %v1353_v11 = vpop.permute.xlu1 %1352 }
 0xc0b   : > { %v1358_v12 = vsel %vm615_vm2, %v1353_v11, 0  ;;  %2190 = vmatmul.mubr.msk.bf16.vlgmr.msra.gmra.mrb[24].mxu1 %vm615_vm2, %v1300_v63 }
 0xc0c   : > { %2194 = vmatpush3.bf16.xpose.msra.mxu0 %v1358_v12  ;;  %2201 = vmatprep.mubr.msk.bf16.mxu1 %vm2405_vm1, %v2404_v8 }
 0xc0d   : > { %2205 = vmatprep.subr.bf16.mxu0 %v2404_v8 }
 0xc13   : > { %2196 = vmatmul.mubr.msk.bf16.vlgmr.msra.gmra.mrb[24].mxu0 %vm615_vm2, %v1301_v6 }
 0xc14   : > { %2207 = vmatprep.mubr.msk.bf16.mxu0 %vm2405_vm1, %v2404_v8 }
 0xcde   : > { %v1345_v13 = vpop.f32.mrb[24].mxu1 }
 0xcdf   : > { %v1400_v14 = vmul.f32 0.25, %v1345_v13  ;;  %v2191_v16 = vpop.f32.mrb[25].mxu1 }
 0xce0   : > { %v1348_v18 = vpop.f32.mrb[26].mxu1 }
 0xce1   : > { %v2192_v19 = vpop.f32.mrb[27].mxu1  ;;  %v1402_v20 = vadd.f32 %v1400_v14, %v2601_v48 }
 0xce3   : > { %v1404_v21 = vsel %vm721_vm3, %v1402_v20, -inf }
 0xce4   : > { %1405 = vmax.xlane.f32.xlu0 %v1404_v21 }
 0xce6   : > { %v1394_v22 = vpop.f32.mrb[24].mxu0 }
 0xce7   : > { %v1401_v24 = vmul.f32 0.25, %v1394_v22  ;;  %v2197_v25 = vpop.f32.mrb[25].mxu0 }
 0xce8   : > { %v1397_v26 = vpop.f32.mrb[26].mxu0  ;;  %v2305_v25 = vld [vmem:[%s2875_s8 + $0x18] sm:$0xff]  }
 0xce9   : > { %v2198_v27 = vpop.f32.mrb[27].mxu0  ;;  %v1403_v28 = vadd.f32 %v1401_v24, %v2601_v48  ;;  %v2304_v24 = vld [vmem:[%s2875_s8 + $0x10] sm:$0xff]  }
 0xceb   : > { %v1407_v29 = vsel %vm721_vm3, %v1403_v28, -inf }
 0xcec   : > { %1408 = vmax.xlane.f32.xlu1 %v1407_v29  ;;  %v2018_v29 = vld [vmem:[%s2874_s7 + $0x2] sm:$0x3] }
 0xcfa   : > { %1428 = vrot.lane.b32.xlu0 %v1300_v63, %s2894_s20 }
 0xd71   : > { %v1406_v30 = vpop.xlane.xlu0 %1405 }
 0xd72   : > { %v1410_v31 = vsub.f32 %v1402_v20, %v1406_v30  ;;  %v1660_v30 = vrot.slane %v2018_v29, %v2551_v15 }
 0xd74   : > { %v1412_v32 = vmul.f32 1.442695, %v1410_v31 }
 0xd75   : > { %v1429_v33 = vpop.permute.xlu0 %1428 }
 0xd76   : > { %2326 = vpow2.f32 %v1412_v32  ;;  %v1434_v34 = vsel %vm751_vm4, %v1429_v33, 0  ;;  %v1665_v33 = vrot.slane %v2018_v29, %v2556_v17 }
 0xd77   : > { %2200 = vmatpush3.bf16.msra.mxu1 %v1434_v34 }
 0xd78   : > { %2211 = vmatprep.subr.bf16.mxu1 %v2404_v8 }
 0xd79   : > { %v1409_v35 = vpop.xlane.xlu1 %1408 }
 0xd7a   : > { %v1411_v36 = vsub.f32 %v1403_v28, %v1409_v35 }
 0xd7c   : > { %v1414_v37 = vmul.f32 1.442695, %v1411_v36 }
 0xd7e   : > { %2328 = vpow2.f32 %v1414_v37  ;;  %v2306_v37 = vld [vmem:[%s2877_s10 + $0x20] sm:$0xff]  }
 0xd80   : > { %v2327_v48 = vpop.eup %2326 }
 0xd81   : > { %v1416_v38 = vsel %vm721_vm3, %v2327_v48, 0.0 }
 0xd82   : > { %1417 = vadd.xlane.f32.xlu0 %v1416_v38  ;;  %v2308_v38 = vld [vmem:[%s2877_s10 + $0x30] sm:$0xff]  }
 0xd88   : > { %v2329_v39 = vpop.eup %2328 }
 0xd89   : > { %v1419_v40 = vsel %vm721_vm3, %v2329_v39, 0.0 }
 0xd8a   : > { %1420 = vadd.xlane.f32.xlu0 %v1419_v40  ;;  %v2024_v40 = vld [vmem:[%s2876_s9 + $0x1] ss:$0 sm:$0xff] }
 0xda0   : > { %1476 = vrot.lane.b32.xlu0 %v1301_v6, %s2894_s20 }
 0xe0f   : > { %v1418_v41 = vpop.xlane.xlu0 %1417 }
 0xe10   : > { %2330 = vrcp.f32 %v1418_v41 }
 0xe17   : > { %v1421_v42 = vpop.xlane.xlu0 %1420 }
 0xe18   : > { %2332 = vrcp.f32 %v1421_v42 }
 0xe1a   : > { %v2331_v43 = vpop.eup %2330 }
 0xe1b   : > { %v1424_v44 = vmul.f32 %v2331_v43, %v2327_v48  ;;  %v1477_v45 = vpop.permute.xlu0 %1476  ;;  %v2307_v48 = vld [vmem:[%s2877_s10 + $0x28] sm:$0xff]  }
 0xe1c   : > { %v1482_v46 = vsel %vm751_vm4, %v1477_v45, 0 }
 0xe1d   : > { %2206 = vmatpush3.bf16.msra.mxu0 %v1482_v46  ;;  %v1426_v47 = vpack.c.bf16 %v1424_v44, %v1424_v44 }
 0xe1e   : > { %2217 = vmatprep.subr.bf16.mxu0 %v2404_v8 }
 0xe1f   : > { %2202 = vmatmul.mubr.msk.bf16.vlgmr.msra.gmra.mrb[28].mxu1 %vm721_vm3, %v1426_v47 }
 0xe20   : > { %2213 = vmatprep.mubr.msk.bf16.mxu1 %vm2405_vm1, %v2404_v8  ;;  %2212 = vmatpush3.bf16.msra.mxu1 %v2302_v52 }
 0xe21   : > { %2223 = vmatprep.subr.bf16.mxu1 %v2404_v8 }
 0xe22   : > { %v2333_v49 = vpop.eup %2332 }
 0xe23   : > { %v1425_v50 = vmul.f32 %v2333_v49, %v2329_v39  ;;  %v2309_v39 = vld [vmem:[%s2877_s10 + $0x38] sm:$0xff]  }
 0xe25   : > { %v1427_v51 = vpack.c.bf16 %v1425_v50, %v1425_v50 }
 0xe27   : > { %2208 = vmatmul.mubr.msk.bf16.vlgmr.msra.gmra.mrb[28].mxu0 %vm721_vm3, %v1427_v51 }
 0xe28   : > { %2219 = vmatprep.mubr.msk.bf16.mxu0 %vm2405_vm1, %v2404_v8  ;;  %2218 = vmatpush3.bf16.msra.mxu0 %v2303_v53 }
 0xe29   : > { %2231 = vmatprep.subr.bf16.mxu0 %v2404_v8 }
 0xef2   : > { %v1470_v54 = vpop.f32.mrb[28].mxu1 }
 0xef3   : > { %v1524_v56 = vpack.c.bf16 %v1470_v54, %v1470_v54  ;;  %v2203_v57 = vpop.f32.mrb[29].mxu1 }
 0xef4   : > { %v1473_v58 = vpop.f32.mrb[30].mxu1  ;;  %v2037_v57 = vld [vmem:[%s2878_s11 + $0x1] ss:$0 sm:$0xff] }
 0xef5   : > { %v2204_v23 = vpop.f32.mrb[31].mxu1  ;;  %2214 = vmatmul.mubr.msk.bf16.vlgmr.msra.gmra.mrb[32].mxu1 %vm615_vm2, %v1524_v56 }
 0xef6   : > { %2227 = vmatprep.mubr.msk.bf16.mxu1 %vm2405_vm1, %v2404_v8  ;;  %2224 = vmatpush3.bf16.msra.mxu1 %v2304_v24 }
 0xef7   : > { %2225 = vmatprep.subr.bf16.mxu1 %v2404_v8 }
 0xefa   : > { %v1518_v59 = vpop.f32.mrb[28].mxu0  ;;  %2226 = vmatpush3.bf16.msra.mxu1 %v2305_v25 }
 0xefb   : > { %v1525_v60 = vpack.c.bf16 %v1518_v59, %v1518_v59  ;;  %v2209_v61 = vpop.f32.mrb[29].mxu0 }
 0xefc   : > { %v1521_v62 = vpop.f32.mrb[30].mxu0 }
 0xefd   : > { %v2210_v63 = vpop.f32.mrb[31].mxu0  ;;  %2220 = vmatmul.mubr.msk.bf16.vlgmr.msra.gmra.mrb[32].mxu0 %vm615_vm2, %v1525_v60 }
 0xefe   : > { %2239 = vmatprep.mubr.msk.bf16.mxu0 %vm2405_vm1, %v2404_v8  ;;  %2232 = vmatpush3.bf16.msra.mxu0 %v2306_v37 }
 0xeff   : > { %2233 = vmatprep.subr.bf16.mxu0 %v2404_v8 }
 0xf02   : > { %2234 = vmatpush3.bf16.msra.mxu0 %v2307_v48 }
 0xf03   : > { %2235 = vmatprep.subr.bf16.mxu0 %v2404_v8 }
 0xf06   : > { %2236 = vmatpush3.bf16.msra.mxu0 %v2308_v38 }
 0xf07   : > { %2237 = vmatprep.subr.bf16.mxu0 %v2404_v8 }
 0xf0a   : > { %2238 = vmatpush3.bf16.msra.mxu0 %v2309_v39 }
 0xfc8   : > { %v1574_v0 = vpop.f32.mrb[32].mxu1 }
 0xfc9   : > { %v2215_v1 = vpop.f32.mrb[33].mxu1  ;;  %v1629_v5 = vsel %vm455_vm0, %v1574_v0, 0.0 }
 0xfca   : > { %v1577_v2 = vpop.f32.mrb[34].mxu1 }
 0xfcb   : > { %v2216_v3 = vpop.f32.mrb[35].mxu1 }
 0xfd0   : > { %v1623_v4 = vpop.f32.mrb[32].mxu0 }
 0xfd1   : > { %v1630_v6 = vsel %vm455_vm0, %v1623_v4, 0.0  ;;  %v2221_v9 = vpop.f32.mrb[33].mxu0 }
 0xfd2   : > { %v1631_v10 = vadd.f32 %v1630_v6, %v1629_v5  ;;  %v1626_v11 = vpop.f32.mrb[34].mxu0  ;;  %v1856_v9 = vsel %vm455_vm0, %v2699_v55, 0.0 }
 0xfd3   : > { %v2222_v12 = vpop.f32.mrb[35].mxu0  ;;  %v1857_v11 = vrot.slane %v1856_v9, 4 }
 0xfd4   : > { %v1640_v13 = vadd.f32 %v2017_v7, %v1631_v10  ;;  %v2043_v10 = vld [vmem:[%s2879_s12 + $0x2] sm:$0x3] }
 0xfd5   : > { %v1849_v12 = vrot.slane %v2043_v10, %v2551_v15 }
 0xfd6   : > { %v1641_v14 = vadd.f32 %v1640_v13, %v2699_v55 }
 0xfd8   : > { %v1644_v16 = vsel %vm455_vm0, %v1641_v14, 0.0 }
 0xfd9   : > { %1645 = vadd.xlane.f32.xlu1 %v1644_v16  ;;  %v1854_v16 = vrot.slane %v2043_v10, %v2556_v17 }
0x1066   : > { %v1646_v18 = vpop.xlane.xlu1 %1645 }
0x1067   : > { %v1647_v19 = vmul.f32 0.03125, %v1646_v18 }
0x1069   : > { %v1648_v20 = vsub.f32 %v1641_v14, %v1647_v19  ;;  %v1858_v14 = vadd.f32 %v1857_v11, %v1856_v9 }
0x106b   : > { %v1649_v21 = vmul.f32 %v1648_v20, %v1648_v20 }
0x106d   : > { %v1650_v22 = vsel %vm455_vm0, %v1649_v21, 0.0 }
0x106e   : > { %1651 = vadd.xlane.f32.xlu0 %v1650_v22 }
0x10fb   : > { %v1652_v26 = vpop.xlane.xlu0 %1651 }
0x10fc   : > { %v1653_v27 = vmul.f32 0.03125, %v1652_v26 }
0x10fe   : > { %v1654_v28 = vadd.f32 1e-12, %v1653_v27 }
0x1100   : > { %2334 = vrsqrt.f32 %v1654_v28 }
0x110a   : > { %v2335_v31 = vpop.eup %2334 }
0x110b   : > { %v1656_v32 = vmul.f32 %v2335_v31, %v1648_v20  ;;  %v1859_v20 = vrot.slane %v1858_v14, 2 }
0x110d   : > { %v1661_v34 = vmul.f32 %v1660_v30, %v1656_v32  ;;  %v1860_v55 = vadd.f32 %v1859_v20, %v1858_v14 }
0x110f   : > { %v1666_v35 = vadd.f32 %v1665_v33, %v1661_v34  ;;  %v1861_v26 = vrot.slane %v1860_v55, 1 }
0x1111   : > { %v1667_v36 = vpack.c.bf16 %v1666_v35, %v1666_v35  ;;  %v1862_v29 = vadd.f32 %v1861_v26, %v1860_v55 }
0x1113   : > { %2228 = vmatmul.mubr.msk.bf16.vlgmr.msra.gmra.mrb[36].mxu1 %vm455_vm0, %v1667_v36  ;;  %v1864_v31 = vmul.f32 0.125, %v1862_v29 }
0x11e6   : > { %v1730_v41 = vpop.f32.mrb[36].mxu1 }
0x11e7   : > { %v1731_v42 = vadd.f32 %v2024_v40, %v1730_v41  ;;  %v2229_v43 = vpop.f32.mrb[37].mxu1 }
0x11e8   : > { %v1733_v44 = vpop.f32.mrb[38].mxu1 }
0x11e9   : > { %v1737_v45 = vmul.f32 0.044715, %v1731_v42  ;;  %v2230_v46 = vpop.f32.mrb[39].mxu1  ;;  %v1736_v53 = vmul.f32 0.5, %v1731_v42 }
0x11eb   : > { %v1738_v47 = vmul.f32 %v1737_v45, %v1731_v42 }
0x11ed   : > { %v1739_v49 = vmul.f32 %v1738_v47, %v1731_v42 }
0x11ef   : > { %v1740_v50 = vadd.f32 %v1739_v49, %v1731_v42 }
0x11f1   : > { %v1741_v51 = vmul.f32 0.7978846, %v1740_v50 }
0x11f3   : > { %2336 = vtanh.f32 %v1741_v51 }
0x11fd   : > { %v2337_v52 = vpop.eup %2336 }
0x11fe   : > { %v1743_v54 = vadd.f32 1.0, %v2337_v52 }
0x1200   : > { %v1744_v8 = vmul.f32 %v1743_v54, %v1736_v53 }
0x1202   : > { %v1745_v56 = vpack.c.bf16 %v1744_v8, %v1744_v8 }
0x1204   : > { %2240 = vmatmul.mubr.msk.bf16.vlgmr.msra.gmra.mrb[36].mxu0 %vm1099_vm5, %v1745_v56 }
0x12d7   : > { %v1824_v58 = vpop.f32.mrb[36].mxu0 }
0x12d8   : > { %v1825_v23 = vadd.f32 %v2037_v57, %v1824_v58  ;;  %v2241_v59 = vpop.f32.mrb[37].mxu0 }
0x12d9   : > { %v1827_v60 = vpop.f32.mrb[38].mxu0 }
0x12da   : > { %v2242_v61 = vpop.f32.mrb[39].mxu0  ;;  %v1830_v62 = vadd.f32 %v1825_v23, %v1666_v35 }
0x12dc   : > { %v1833_v63 = vsel %vm455_vm0, %v1830_v62, 0.0 }
0x12dd   : > { %1834 = vadd.xlane.f32.xlu1 %v1833_v63 }
0x136a   : > { %v1835_v0 = vpop.xlane.xlu1 %1834 }
0x136b   : > { %v1836_v1 = vmul.f32 0.03125, %v1835_v0 }
0x136d   : > { %v1837_v2 = vsub.f32 %v1830_v62, %v1836_v1 }
0x136f   : > { %v1838_v3 = vmul.f32 %v1837_v2, %v1837_v2 }
0x1371   : > { %v1839_v4 = vsel %vm455_vm0, %v1838_v3, 0.0 }
0x1372   : > { %1840 = vadd.xlane.f32.xlu1 %v1839_v4 }
0x13ff   : > { %v1841_v5 = vpop.xlane.xlu1 %1840 }
0x1400   : > { %v1842_v6 = vmul.f32 0.03125, %v1841_v5 }
0x1402   : > { %v1843_v7 = vadd.f32 1e-12, %v1842_v6 }
0x1404   : > { %2338 = vrsqrt.f32 %v1843_v7 }
0x140e   : > { %v2339_v13 = vpop.eup %2338 }
0x140f   : > { %v1845_v18 = vmul.f32 %v2339_v13, %v1837_v2 }
0x1411   : > { %v1850_v19 = vmul.f32 %v1849_v12, %v1845_v18 }
0x1413   : > { %v1855_v21 = vadd.f32 %v1854_v16, %v1850_v19 }
0x1415   : > { %v1865_v22 = vsel %vm455_vm0, %v1855_v21, 0.0 }
0x1416   : > { %v1866_v24 = vrot.slane %v1865_v22, 4 }
0x1418   : > { %v1867_v25 = vadd.f32 %v1866_v24, %v1865_v22 }
0x141a   : > { %v1868_v27 = vrot.slane %v1867_v25, 2 }
0x141c   : > { %v1869_v28 = vadd.f32 %v1868_v27, %v1867_v25 }
0x141e   : > { %v1870_v15 = vrot.slane %v1869_v28, 1 }
0x1420   : > { %v1871_v30 = vadd.f32 %v1870_v15, %v1869_v28 }
0x1422   : > { %v1872_v17 = vmul.f32 0.125, %v1871_v30 }
0x1424   : > { %v1873_v32 = vadd.f32 %v1872_v17, %v1864_v31 }
0x1426   : > { %v1874_v33 = vmul.f32 0.5, %v1873_v32 }
0x1428   : > { %1876 = vst.msk [vmem:[%s441_s22] sm:$0x1] %vm1875_vm6, %v1874_v33 }
0x1429   : > { %2353 = shalt.err (!%p2350_p3)
}
0x142a   : > { %s2354_s16 = scalar_lea.hbm %s2825_s30, 16  ;;  %s2358_s23 = scalar_lea.hbm %s2880_s13, 32 }
0x142b   : > { %p2355_p4 = scmp.ne.s32.totalorder %s2825_s30, %s2354_s16  ;;  %p2359_p9 = scmp.lt.u32.totalorder %s2825_s30, %s2880_s13 }
0x142c   : > { %p2360_p10 = scmp.lt.u32.totalorder %s2358_s23, %s2354_s16  ;;  %p2362_p12 = scmp.lt.u32.totalorder %s2354_s16, %s2825_s30 }
0x142d   : > { %p2356_p7 = pnand %p2355_p4, %p2517_p5 }
0x142e   : > { %p2361_p11 = por %p2360_p10, %p2359_p9 }
0x142f   : > { %p2357_p8 = pneg %p2356_p7 }
0x1430   : > { %p2363_p13 = por %p2362_p12, %p2361_p11 }
0x1432   : > { %p2364_p0 = pnand %p2363_p13, %p2357_p8 }
0x1434   : > { %2367 = shalt.err (!%p2364_p0)
}
0x1435   : > { %2243 = dma.vmem_to_hbm [thread:$0]  (%p2517_p5), %s2827_s24, 16, %s2825_s30, %s1878_s15  }
0x1436 PF: > { %p2249_p1 = scmp.ge.s32.totalorder %s2402_s28, 2  ;;  %s1902_s0 = sand.u32 1, %s2390_s25  }
0x1437   : > { %s1903_s2 = scalar_lea.sflag [#allocation3], %s1902_s0 }
0x1438   : > { %p2246_p2 = pnand %p2249_p1, %p2521_p6 }
0x143a   : > { %2385 = dma.done.wait (!%p2246_p2), %s1903_s2, 16  }
0x143b   : > { %2387 = vsyncadd (!%p2246_p2), %s1903_s2, 4294967280  ;;  %p23_p3 = scmp.ge.s32.totalorder %s2504_s14, 4   ;;  %s2895_s25 = smov %s2394_s26 }
0x143c   : > { %s2896_s26 = smov %s2398_s27  ;;  %s2897_s27 = smov %s2515_s17 }
0x143d   : > { %s2898_s28 = smov %s2504_s14  ;;  %25 = sbr.rel (!%p23_p3) target bundleno = 7 (0x7), region = 120 }
0x1444   :  { %1907 = vsyncpa [#allocation3], 1 }
0x1445   :  { %1909 = vsyncpa [#allocation3 + $0x1], 1 }

</bundles_post_ra>
